<compile_context>
chip_gen: v7x
topology: tpu7x:2x2x1
jax: 0.10.0
libtpu: 0.0.40
codegen_flags: <defaults>
</compile_context>

<pallas_src>
import jax
import jax.numpy as jnp
from jax.experimental import pallas as pl
from jax.experimental.pallas import tpu as pltpu

OUT_FEATURES = 32 * 32  # fixed by the module (nn.Unflatten(1, (32, 32)))


def _round_up(x, m):
    return ((x + m - 1) // m) * m


def _encoder_kernel(h_ref, e_ref, wh_ref, we_ref, o_ref):
    """out = [h | e] @ W as two MXU matmuls accumulated in f32 (no concat)."""
    acc = jnp.dot(h_ref[...], wh_ref[...], preferred_element_type=jnp.float32)
    acc = acc + jnp.dot(e_ref[...], we_ref[...], preferred_element_type=jnp.float32)
    o_ref[...] = acc.astype(o_ref.dtype)


def _call_encoder(h, e, w_h, w_e, *, block_n, out_dtype, single_buffer_weight):
    N, h_size = h.shape
    _, embed_size = e.shape
    in_features = h_size + embed_size
    grid = (pl.cdiv(N, block_n),)  # ragged tail rows are masked on store

    # Weight is DMA'd once (constant index_map); single-buffer it if allowed.
    w_kwargs = dict(pipeline_mode=pl.Buffered(1)) if single_buffer_weight else {}

    act_itemsize = jnp.dtype(h.dtype).itemsize
    out_itemsize = jnp.dtype(out_dtype).itemsize
    cost = pl.CostEstimate(
        flops=2 * N * in_features * OUT_FEATURES,
        transcendentals=0,
        bytes_accessed=(h.size + e.size + w_h.size + w_e.size) * act_itemsize
        + N * OUT_FEATURES * out_itemsize,
    )

    # VMEM working set: double-buffered activation/output tiles + weight
    # (x1 or x2 buffers) + scratch margin.  Cap below v7x physical VMEM.
    w_buffers = 1 if single_buffer_weight else 2
    vmem_bytes = (
        2 * block_n * in_features * act_itemsize
        + w_buffers * in_features * OUT_FEATURES * act_itemsize
        + 2 * block_n * OUT_FEATURES * out_itemsize
        + (2 << 20)
    )
    vmem_limit = int(min(max(vmem_bytes, 16 << 20), 48 << 20))

    return pl.pallas_call(
        _encoder_kernel,
        out_shape=jax.ShapeDtypeStruct((N, OUT_FEATURES), out_dtype),
        grid_spec=pltpu.PrefetchScalarGridSpec(
            num_scalar_prefetch=0,
            grid=grid,
            in_specs=[
                pl.BlockSpec((block_n, h_size), lambda i: (i, 0)),
                pl.BlockSpec((block_n, embed_size), lambda i: (i, 0)),
                pl.BlockSpec((h_size, OUT_FEATURES), lambda i: (0, 0), **w_kwargs),
                pl.BlockSpec((embed_size, OUT_FEATURES), lambda i: (0, 0), **w_kwargs),
            ],
            out_specs=pl.BlockSpec((block_n, OUT_FEATURES), lambda i: (i, 0)),
        ),
        compiler_params=pltpu.CompilerParams(
            dimension_semantics=("parallel",),
            vmem_limit_bytes=vmem_limit,
        ),
        cost_estimate=cost,
    )(h, e, w_h, w_e)


def linear_encoder(h, e, w, *, block_n=None, compute_dtype=jnp.bfloat16,
                   out_dtype=None):
    """
    h : [N, h_size]                      float32 (or bf16)
    e : [N, embed_size]                  float32 (or bf16)
    w : [h_size + embed_size, 1024]      transposed nn.Linear weight
    returns: [N, 32, 32] in out_dtype (defaults to h.dtype, i.e. f32)
    """
    N, h_size = h.shape
    _, embed_size = e.shape
    in_features = h_size + embed_size
    assert w.shape == (in_features, OUT_FEATURES)
    if out_dtype is None:
        out_dtype = h.dtype  # match PyTorch default (f32)

    # bf16 operands for the MXU; XLA fuses the slice + convert of the weight.
    hc = h.astype(compute_dtype)
    ec = e.astype(compute_dtype)
    w_h = w[:h_size].astype(compute_dtype)
    w_e = w[h_size:].astype(compute_dtype)

    # --- batch tile size -----------------------------------------------------
    if block_n is None:
        if N <= 128:
            block_n = N          # tiny batch: one grid step
        else:
            # >= 4 grid steps so on v7x both TensorCores get >= 2 steps and
            # input DMA / output writeback overlap compute; tiles up to 1024
            # rows amortize the ~0.35us/step overhead on v5e/v6e.
            block_n = min(1024, _round_up(pl.cdiv(N, 4), 128))
    block_n = max(1, min(int(block_n), N))
    if block_n < N:
        # (8,128) block rule; round to 16 so bf16 sublane packing stays aligned.
        block_n = min(_round_up(block_n, 16), N)

    try:
        out = _call_encoder(hc, ec, w_h, w_e, block_n=block_n,
                            out_dtype=out_dtype, single_buffer_weight=True)
    except Exception:
        # pl.Buffered(1) unsupported on this jax/libtpu combo -> default
        # double-buffered weight (slightly more VMEM, identical result).
        out = _call_encoder(hc, ec, w_h, w_e, block_n=block_n,
                            out_dtype=out_dtype, single_buffer_weight=False)

    # nn.Unflatten(1, (32, 32)): pure metadata reshape.  Kept outside the
    # kernel (a 32-wide last dim is lane-sparse); keep (N, 1024) downstream
    # as long as possible to avoid relayout copies.
    return out.reshape(N, 32, 32)


if __name__ == "__main__":
    # Small, module-consistent shapes:
    #   cnn_multi=1 -> embed_size = 4*4*1*2**3 = 128 ; h_size=128 ; N=8
    cnn_multi = 1
    h_size = 128
    embed_size = 4 * 4 * cnn_multi * 2 ** 3  # 128
    N = 8

    key = jax.random.PRNGKey(0)
    k_h, k_e, k_w = jax.random.split(key, 3)

    h = jax.random.normal(k_h, (N, h_size), dtype=jnp.float32)
    e = jax.random.normal(k_e, (N, embed_size), dtype=jnp.float32)

    # Deterministic synthetic weight (stands in for init_weights); stored as
    # [in_features, out_features], i.e. the transpose of nn.Linear.weight.
    in_features = h_size + embed_size
    w = (jax.random.normal(k_w, (in_features, OUT_FEATURES), dtype=jnp.float32)
         * (1.0 / float(in_features) ** 0.5))

    out = linear_encoder(h, e, w)
    out = jax.block_until_ready(out)

    # Reference check against plain JAX (same math as the PyTorch forward).
    ref = (jnp.concatenate([h, e], axis=-1) @ w).reshape(N, 32, 32)
    assert out.shape == (N, 32, 32)
    assert out.dtype == jnp.float32
    # bf16 operands / f32 accumulation: looser tolerance vs the f32 reference.
    err = float(jnp.max(jnp.abs(out - ref)))
    assert jnp.allclose(out, ref, atol=3e-2, rtol=3e-2), f"max abs err {err}"

    print("KERNEL_OK")
</pallas_src>

<mosaic_0001>
module attributes {stable_mosaic.version = 11 : i64} {
  func.func @_encoder_kernel(%arg0: i32, %arg1: memref<8x128xbf16, #tpu.memory_space<vmem>>, %arg2: memref<8x128xbf16, #tpu.memory_space<vmem>>, %arg3: memref<128x1024xbf16, #tpu.memory_space<vmem>>, %arg4: memref<128x1024xbf16, #tpu.memory_space<vmem>>, %arg5: memref<8x1024xf32, #tpu.memory_space<vmem>>) attributes {dimension_semantics = [#tpu.dimension_semantics<parallel>], iteration_bounds = array<i64: 1>, scalar_prefetch = 0 : i64, scratch_operands = 0 : i64, tpu.core_type = #tpu.core_type<tc>, window_params = [{transform_indices = @transform_0, window_bounds = array<i64: 8, 128>}, {transform_indices = @transform_1, window_bounds = array<i64: 8, 128>}, {pipeline_mode = #tpu.pipeline_mode<synchronous>, transform_indices = @transform_2, window_bounds = array<i64: 128, 1024>}, {pipeline_mode = #tpu.pipeline_mode<synchronous>, transform_indices = @transform_3, window_bounds = array<i64: 128, 1024>}, {transform_indices = @transform_4, window_bounds = array<i64: 8, 1024>}]} {
    %c0 = arith.constant 0 : index
    %c0_0 = arith.constant 0 : index
    %0 = vector.load %arg1[%c0, %c0_0] : memref<8x128xbf16, #tpu.memory_space<vmem>>, vector<8x128xbf16>
    %c0_1 = arith.constant 0 : index
    %c0_2 = arith.constant 0 : index
    %1 = vector.load %arg3[%c0_1, %c0_2] : memref<128x1024xbf16, #tpu.memory_space<vmem>>, vector<128x1024xbf16>
    %cst = arith.constant dense<0.000000e+00> : vector<8x1024xf32>
    %2 = tpu.matmul %0, %1, %cst {dimension_numbers = #tpu.dot_dimension_numbers<[1], [0], [0], [1], [0, 0, 1, 1], [], []>} : vector<8x128xbf16>, vector<128x1024xbf16>, vector<8x1024xf32> -> vector<8x1024xf32>
    %c0_3 = arith.constant 0 : index
    %c0_4 = arith.constant 0 : index
    %3 = vector.load %arg2[%c0_3, %c0_4] : memref<8x128xbf16, #tpu.memory_space<vmem>>, vector<8x128xbf16>
    %c0_5 = arith.constant 0 : index
    %c0_6 = arith.constant 0 : index
    %4 = vector.load %arg4[%c0_5, %c0_6] : memref<128x1024xbf16, #tpu.memory_space<vmem>>, vector<128x1024xbf16>
    %cst_7 = arith.constant dense<0.000000e+00> : vector<8x1024xf32>
    %5 = tpu.matmul %3, %4, %cst_7 {dimension_numbers = #tpu.dot_dimension_numbers<[1], [0], [0], [1], [0, 0, 1, 1], [], []>} : vector<8x128xbf16>, vector<128x1024xbf16>, vector<8x1024xf32> -> vector<8x1024xf32>
    %6 = arith.addf %2, %5 : vector<8x1024xf32>
    %c0_8 = arith.constant 0 : index
    %c0_9 = arith.constant 0 : index
    %7 = vector.load %arg5[%c0_8, %c0_9] : memref<8x1024xf32, #tpu.memory_space<vmem>>, vector<8x1024xf32>
    tpu.vector_store %arg5[%c0_8, %c0_9], %6 {strides = array<i32>} : memref<8x1024xf32, #tpu.memory_space<vmem>>, vector<8x1024xf32>,
    return
  }
  func.func @transform_0(%arg0: i32) -> (i32, i32) {
    %c0_i32 = arith.constant 0 : i32
    %c0_i32_0 = arith.constant 0 : i32
    return %arg0, %c0_i32 : i32, i32
  }
  func.func @transform_1(%arg0: i32) -> (i32, i32) {
    %c0_i32 = arith.constant 0 : i32
    %c0_i32_0 = arith.constant 0 : i32
    return %arg0, %c0_i32 : i32, i32
  }
  func.func @transform_2(%arg0: i32) -> (i32, i32) {
    %c0_i32 = arith.constant 0 : i32
    %c0_i32_0 = arith.constant 0 : i32
    %c0_i32_1 = arith.constant 0 : i32
    return %c0_i32, %c0_i32_0 : i32, i32
  }
  func.func @transform_3(%arg0: i32) -> (i32, i32) {
    %c0_i32 = arith.constant 0 : i32
    %c0_i32_0 = arith.constant 0 : i32
    %c0_i32_1 = arith.constant 0 : i32
    return %c0_i32, %c0_i32_0 : i32, i32
  }
  func.func @transform_4(%arg0: i32) -> (i32, i32) {
    %c0_i32 = arith.constant 0 : i32
    %c0_i32_0 = arith.constant 0 : i32
    return %arg0, %c0_i32 : i32, i32
  }
}

module attributes {stable_mosaic.version = 11 : i64} {
  func.func @_encoder_kernel(%arg0: i32, %arg1: memref<8x128xbf16, #tpu.memory_space<vmem>>, %arg2: memref<8x128xbf16, #tpu.memory_space<vmem>>, %arg3: memref<128x1024xbf16, #tpu.memory_space<vmem>>, %arg4: memref<128x1024xbf16, #tpu.memory_space<vmem>>, %arg5: memref<8x1024xf32, #tpu.memory_space<vmem>>) attributes {dimension_semantics = [#tpu.dimension_semantics<parallel>], iteration_bounds = array<i64: 1>, scalar_prefetch = 0 : i64, scratch_operands = 0 : i64, tpu.core_type = #tpu.core_type<tc>, window_params = [{transform_indices = @transform_0, window_bounds = array<i64: 8, 128>}, {transform_indices = @transform_1, window_bounds = array<i64: 8, 128>}, {pipeline_mode = #tpu.pipeline_mode<synchronous>, transform_indices = @transform_2, window_bounds = array<i64: 128, 1024>}, {pipeline_mode = #tpu.pipeline_mode<synchronous>, transform_indices = @transform_3, window_bounds = array<i64: 128, 1024>}, {transform_indices = @transform_4, window_bounds = array<i64: 8, 1024>}]} {
    %c0 = arith.constant 0 : index
    %c0_0 = arith.constant 0 : index
    %0 = vector.load %arg1[%c0, %c0_0] : memref<8x128xbf16, #tpu.memory_space<vmem>>, vector<8x128xbf16>
    %c0_1 = arith.constant 0 : index
    %c0_2 = arith.constant 0 : index
    %1 = vector.load %arg3[%c0_1, %c0_2] : memref<128x1024xbf16, #tpu.memory_space<vmem>>, vector<128x1024xbf16>
    %cst = arith.constant dense<0.000000e+00> : vector<8x1024xf32>
    %2 = tpu.matmul %0, %1, %cst {dimension_numbers = #tpu.dot_dimension_numbers<[1], [0], [0], [1], [0, 0, 1, 1], [], []>} : vector<8x128xbf16>, vector<128x1024xbf16>, vector<8x1024xf32> -> vector<8x1024xf32>
    %c0_3 = arith.constant 0 : index
    %c0_4 = arith.constant 0 : index
    %3 = vector.load %arg2[%c0_3, %c0_4] : memref<8x128xbf16, #tpu.memory_space<vmem>>, vector<8x128xbf16>
    %c0_5 = arith.constant 0 : index
    %c0_6 = arith.constant 0 : index
    %4 = vector.load %arg4[%c0_5, %c0_6] : memref<128x1024xbf16, #tpu.memory_space<vmem>>, vector<128x1024xbf16>
    %cst_7 = arith.constant dense<0.000000e+00> : vector<8x1024xf32>
    %5 = tpu.matmul %3, %4, %cst_7 {dimension_numbers = #tpu.dot_dimension_numbers<[1], [0], [0], [1], [0, 0, 1, 1], [], []>} : vector<8x128xbf16>, vector<128x1024xbf16>, vector<8x1024xf32> -> vector<8x1024xf32>
    %6 = arith.addf %2, %5 : vector<8x1024xf32>
    %c0_8 = arith.constant 0 : index
    %c0_9 = arith.constant 0 : index
    %7 = vector.load %arg5[%c0_8, %c0_9] : memref<8x1024xf32, #tpu.memory_space<vmem>>, vector<8x1024xf32>
    tpu.vector_store %arg5[%c0_8, %c0_9], %6 {strides = array<i32>} : memref<8x1024xf32, #tpu.memory_space<vmem>>, vector<8x1024xf32>,
    return
  }
  func.func @transform_0(%arg0: i32) -> (i32, i32) {
    %c0_i32 = arith.constant 0 : i32
    %c0_i32_0 = arith.constant 0 : i32
    return %arg0, %c0_i32 : i32, i32
  }
  func.func @transform_1(%arg0: i32) -> (i32, i32) {
    %c0_i32 = arith.constant 0 : i32
    %c0_i32_0 = arith.constant 0 : i32
    return %arg0, %c0_i32 : i32, i32
  }
  func.func @transform_2(%arg0: i32) -> (i32, i32) {
    %c0_i32 = arith.constant 0 : i32
    %c0_i32_0 = arith.constant 0 : i32
    %c0_i32_1 = arith.constant 0 : i32
    return %c0_i32, %c0_i32_0 : i32, i32
  }
  func.func @transform_3(%arg0: i32) -> (i32, i32) {
    %c0_i32 = arith.constant 0 : i32
    %c0_i32_0 = arith.constant 0 : i32
    %c0_i32_1 = arith.constant 0 : i32
    return %c0_i32, %c0_i32_0 : i32, i32
  }
  func.func @transform_4(%arg0: i32) -> (i32, i32) {
    %c0_i32 = arith.constant 0 : i32
    %c0_i32_0 = arith.constant 0 : i32
    return %arg0, %c0_i32 : i32, i32
  }
}

</mosaic_0001>

<bundles_post_ra>
// kernel: tpu_custom_call.1
= control target key start
LH: loop header
LB: loop body
LE: loop exit
PB: predicated region body
PF: predicated region fallthrough
CT: control target
= control target key end

     0   :  { %9 = vsyncpa [#allocation3], 0  ;;  %s1576_s0 = inlined_call_operand.hbm [shape: bf16[8,128], index: 0, kind: input, shape index: {}]   ;;  %s1577_s1 = inlined_call_operand.hbm [shape: bf16[8,128], index: 1, kind: input, shape index: {}]   ;;  %s1578_s2 = inlined_call_operand.hbm [shape: bf16[128,1024], index: 2, kind: input, shape index: {}]   ;;  %s1579_s3 = inlined_call_operand.hbm [shape: bf16[128,1024], index: 3, kind: input, shape index: {}]   ;;  %s1580_s4 = inlined_call_operand.hbm [shape: f32[8,1024], index: 4, kind: output, shape index: {}]  }
   0x1   :  { %10 = vsyncpa [#allocation6], 0 }
   0x2   :  { %11 = vsyncpa [#allocation9], 0 }
   0x3   :  { %12 = vsyncpa [#allocation4], 0  ;;  %s1463_s15 = smov [#allocation5]   ;;  %s1464_s17 = smov [#allocation2]  }
   0x4   :  { %s29_s16 = sshll.u32 %s1463_s15, 4  ;;  %s19_s18 = sshll.u32 %s1464_s17, 4  ;;  %s30_s16 = int_to_ptr.vmem [resolvable:$true] %s29_s16  ;;  %s20_s18 = int_to_ptr.vmem [resolvable:$true] %s19_s18 }
   0x5   :  { %s1345_s21 = scalar_lea.hbm %s1577_s1, 64 }
   0x6   :  { %p1346_p0 = scmp.ne.s32.totalorder %s1577_s1, %s1345_s21  ;;  %p1349_p1 = scmp.lt.u32.totalorder %s1345_s21, %s1577_s1 }
   0x8   :  { %p1351_p2 = pnand %p1349_p1, %p1346_p0 }
   0xa   :  { %1354 = shalt.err (!%p1351_p2)
}
   0xb   :  { %s1355_s26 = scalar_lea.vmem %s30_s16, 64  ;;  %p1360_p4 = scmp.lt.s32.totalorder %s30_s16, %s30_s16 }
   0xc   :  { %p1356_p3 = scmp.ne.s32.totalorder %s30_s16, %s1355_s26  ;;  %p1361_p5 = scmp.lt.s32.totalorder %s1355_s26, %s1355_s26 }
   0xe   :  { %p1362_p6 = por %p1361_p5, %p1360_p4 }
  0x10   :  { %p1363_p7 = pnand %p1362_p6, %p1356_p3 }
  0x12   :  { %1366 = shalt.err (!%p1363_p7)
}
  0x13   :  { %32 = dma.hbm_to_vmem [thread:$0]  %s1577_s1, 64, %s30_s16, [#allocation6]  }
  0x14   :  { %s1367_s5 = scalar_lea.hbm %s1576_s0, 64 }
  0x15   :  { %p1368_p8 = scmp.ne.s32.totalorder %s1576_s0, %s1367_s5  ;;  %p1371_p9 = scmp.lt.u32.totalorder %s1367_s5, %s1576_s0 }
  0x17   :  { %p1373_p10 = pnand %p1371_p9, %p1368_p8 }
  0x19   :  { %1376 = shalt.err (!%p1373_p10)
}
  0x1a   :  { %s1377_s10 = scalar_lea.vmem %s20_s18, 64  ;;  %p1382_p12 = scmp.lt.s32.totalorder %s20_s18, %s20_s18 }
  0x1b   :  { %p1378_p11 = scmp.ne.s32.totalorder %s20_s18, %s1377_s10  ;;  %p1383_p13 = scmp.lt.s32.totalorder %s1377_s10, %s1377_s10 }
  0x1d   :  { %p1384_p0 = por %p1383_p13, %p1382_p12 }
  0x1f   :  { %p1385_p1 = pnand %p1384_p0, %p1378_p11 }
  0x21   :  { %1388 = shalt.err (!%p1385_p1)
}
  0x22   :  { %22 = dma.hbm_to_vmem [thread:$0]  %s1576_s0, 64, %s20_s18, [#allocation3]  }
  0x23   :  { %s1465_s12 = smov [#allocation7]   ;;  %s1389_s16 = scalar_lea.hbm %s1578_s2, 8192 }
  0x24   :  { %s38_s13 = sshll.u32 %s1465_s12, 4  ;;  %p1390_p2 = scmp.ne.s32.totalorder %s1578_s2, %s1389_s16  ;;  %s39_s13 = int_to_ptr.vmem [resolvable:$true] %s38_s13 }
  0x25   :  { %p1393_p3 = scmp.lt.u32.totalorder %s1389_s16, %s1578_s2 }
  0x27   :  { %p1395_p4 = pnand %p1393_p3, %p1390_p2 }
  0x29   :  { %1398 = shalt.err (!%p1395_p4)
}
  0x2a   :  { %s1399_s22 = scalar_lea.vmem %s39_s13, 8192  ;;  %p1404_p6 = scmp.lt.s32.totalorder %s39_s13, %s39_s13 }
  0x2b   :  { %p1400_p5 = scmp.ne.s32.totalorder %s39_s13, %s1399_s22  ;;  %p1405_p7 = scmp.lt.s32.totalorder %s1399_s22, %s1399_s22 }
  0x2d   :  { %p1406_p8 = por %p1405_p7, %p1404_p6 }
  0x2f   :  { %p1407_p9 = pnand %p1406_p8, %p1400_p5 }
  0x31   :  { %1410 = shalt.err (!%p1407_p9)
}
  0x32   :  { %s1466_s0 = smov 512   ;;  %s1467_s18 = smov 32  }
  0x33   :  { %44 = dma.hbm_to_vmem [thread:$0]  %s1578_s2, 8192, %s39_s13, [#allocation6], %s1466_s0, %s1466_s0, %s1467_s18  }
  0x34   :  { %s1468_s25 = smov [#allocation8]   ;;  %s1411_s29 = scalar_lea.hbm %s1579_s3, 8192 }
  0x35   :  { %s50_s26 = sshll.u32 %s1468_s25, 4  ;;  %p1412_p10 = scmp.ne.s32.totalorder %s1579_s3, %s1411_s29  ;;  %s51_s26 = int_to_ptr.vmem [resolvable:$true] %s50_s26 }
  0x36   :  { %p1415_p11 = scmp.lt.u32.totalorder %s1411_s29, %s1579_s3 }
  0x38   :  { %p1417_p12 = pnand %p1415_p11, %p1412_p10 }
  0x3a   :  { %1420 = shalt.err (!%p1417_p12)
}
  0x3b   :  { %s1421_s8 = scalar_lea.vmem %s51_s26, 8192  ;;  %p1426_p0 = scmp.lt.s32.totalorder %s51_s26, %s51_s26 }
  0x3c   :  { %p1422_p13 = scmp.ne.s32.totalorder %s51_s26, %s1421_s8  ;;  %p1427_p1 = scmp.lt.s32.totalorder %s1421_s8, %s1421_s8 }
  0x3e   :  { %p1428_p2 = por %p1427_p1, %p1426_p0 }
  0x40   :  { %p1429_p3 = pnand %p1428_p2, %p1422_p13 }
  0x42   :  { %1432 = shalt.err (!%p1429_p3)
}
  0x43   :  { %56 = dma.hbm_to_vmem [thread:$0]  %s1579_s3, 8192, %s51_s26, [#allocation9], %s1466_s0, %s1466_s0, %s1467_s18  }
  0x44   :  { %1455 = dma.done.wait [#allocation3], 64  }
  0x45   :  { %1456 = vsyncadd [#allocation3], 4294967232 }
  0x46   :  { %1457 = dma.done.wait [#allocation6], 8256  }
  0x47   :  { %1458 = vsyncadd [#allocation6], 4294959040 }
  0x48   :  { %1459 = dma.done.wait [#allocation9], 8192  }
  0x49   :  { %1460 = vsyncadd [#allocation9], 4294959104  ;;  %v1469_v0 = vmov 0   ;;  %v136_v1 = vld [vmem:[#allocation8] sm:$0xff]  ;;  %v137_v3 = vld [vmem:[#allocation8 + $0x8] sm:$0xff]  ;;  %s1470_s3 = smov [#allocation10]  }
  0x4a   :  { %552 = vmatprep.mubr.bf16.mxu0 %v1469_v0  ;;  %593 = vmatprep.mubr.bf16.mxu1 %v1469_v0  ;;  %v140_v2 = vld [vmem:[#allocation8 + $0x20] sm:$0xff]  ;;  %v141_v5 = vld [vmem:[#allocation8 + $0x28] sm:$0xff]  ;;  %v138_v63 = vld [vmem:[#allocation8 + $0x10] sm:$0xff]  ;;  %s1182_s10 = sshll.u32 %s1470_s3, 4  ;;  %s1183_s10 = int_to_ptr.vmem [resolvable:$true] %s1182_s10 }
  0x4b   :  { %v1194_v4 = vcombine.high %v136_v1, %v140_v2  ;;  %v1193_v6 = vcombine.low %v136_v1, %v140_v2  ;;  %v144_v7 = vld [vmem:[#allocation8 + $0x40] sm:$0xff]  ;;  %v1196_v9 = vcombine.high %v137_v3, %v141_v5  ;;  %v1195_v10 = vcombine.low %v137_v3, %v141_v5  ;;  %v145_v12 = vld [vmem:[#allocation8 + $0x48] sm:$0xff]  ;;  %v142_v1 = vld [vmem:[#allocation8 + $0x30] sm:$0xff]  ;;  %s1433_s1 = scalar_lea.vmem %s1183_s10, 1024  ;;  %p1438_p5 = scmp.lt.s32.totalorder %s1183_s10, %s1183_s10 }
  0x4c   :  { %v148_v8 = vld [vmem:[#allocation8 + $0x60] sm:$0xff]  ;;  %v149_v13 = vld [vmem:[#allocation8 + $0x68] sm:$0xff]  ;;  %v139_v2 = vld [vmem:[#allocation8 + $0x18] sm:$0xff]  ;;  %p1434_p4 = scmp.ne.s32.totalorder %s1183_s10, %s1433_s1  ;;  %p1439_p6 = scmp.lt.s32.totalorder %s1433_s1, %s1433_s1 }
  0x4d   :  { %v1202_v11 = vcombine.high %v144_v7, %v148_v8  ;;  %v152_v14 = vld [vmem:[#allocation8 + $0x80] sm:$0xff]  ;;  %520 = vmatprep.subr.bf16.mxu0 %v1194_v4  ;;  %v1204_v15 = vcombine.high %v145_v12, %v149_v13  ;;  %v153_v17 = vld [vmem:[#allocation8 + $0x88] sm:$0xff]  ;;  %561 = vmatprep.subr.bf16.mxu1 %v1196_v9  ;;  %v1201_v19 = vcombine.low %v144_v7, %v148_v8  ;;  %v143_v3 = vld [vmem:[#allocation8 + $0x38] sm:$0xff] }
  0x4e   :  { %v156_v16 = vld [vmem:[#allocation8 + $0xa0] sm:$0xff]  ;;  %v157_v18 = vld [vmem:[#allocation8 + $0xa8] sm:$0xff]  ;;  %521 = vmatpush1.bf16.msra.mxu0 %v1193_v6  ;;  %562 = vmatpush1.bf16.msra.mxu1 %v1195_v10  ;;  %v1203_v20 = vcombine.low %v145_v12, %v149_v13  ;;  %v1198_v6 = vcombine.high %v138_v63, %v142_v1  ;;  %v1200_v7 = vcombine.high %v139_v2, %v143_v3  ;;  %v146_v8 = vld [vmem:[#allocation8 + $0x50] sm:$0xff]  ;;  %p1440_p7 = por %p1439_p6, %p1438_p5 }
  0x4f   :  { %522 = vmatprep.subr.bf16.mxu0 %v1202_v11  ;;  %v1210_v21 = vcombine.high %v152_v14, %v156_v16  ;;  %563 = vmatprep.subr.bf16.mxu1 %v1204_v15  ;;  %v1212_v22 = vcombine.high %v153_v17, %v157_v18  ;;  %v160_v23 = vld [vmem:[#allocation8 + $0xc0] sm:$0xff]  ;;  %v161_v25 = vld [vmem:[#allocation8 + $0xc8] sm:$0xff]  ;;  %v1209_v27 = vcombine.low %v152_v14, %v156_v16  ;;  %v150_v9 = vld [vmem:[#allocation8 + $0x70] sm:$0xff] }
  0x50   :  { %v164_v24 = vld [vmem:[#allocation8 + $0xe0] sm:$0xff]  ;;  %v165_v26 = vld [vmem:[#allocation8 + $0xe8] sm:$0xff]  ;;  %v1211_v28 = vcombine.low %v153_v17, %v157_v18  ;;  %v147_v10 = vld [vmem:[#allocation8 + $0x58] sm:$0xff]  ;;  %v1197_v12 = vcombine.low %v138_v63, %v142_v1  ;;  %v1199_v14 = vcombine.low %v139_v2, %v143_v3  ;;  %v1206_v15 = vcombine.high %v146_v8, %v150_v9  ;;  %p1441_p8 = pnand %p1440_p7, %p1434_p4 }
  0x51   :  { %v1218_v29 = vcombine.high %v160_v23, %v164_v24  ;;  %v1220_v30 = vcombine.high %v161_v25, %v165_v26  ;;  %v168_v31 = vld [vmem:[#allocation8 + $0x100] sm:$0xff]  ;;  %v169_v33 = vld [vmem:[#allocation8 + $0x108] sm:$0xff]  ;;  %v1217_v35 = vcombine.low %v160_v23, %v164_v24  ;;  %v1219_v36 = vcombine.low %v161_v25, %v165_v26  ;;  %v151_v11 = vld [vmem:[#allocation8 + $0x78] sm:$0xff] }
  0x52   :  { %523 = vmatpush1.bf16.msra.mxu0 %v1201_v19  ;;  %564 = vmatpush1.bf16.msra.mxu1 %v1203_v20  ;;  %v172_v32 = vld [vmem:[#allocation8 + $0x120] sm:$0xff]  ;;  %v173_v34 = vld [vmem:[#allocation8 + $0x128] sm:$0xff]  ;;  %v1546_v13 = vld [vmem:[#allocation5] sm:$0xf]  ;;  %v1208_v16 = vcombine.high %v147_v10, %v151_v11 }
  0x53   :  { %524 = vmatprep.subr.bf16.mxu0 %v1210_v21  ;;  %565 = vmatprep.subr.bf16.mxu1 %v1212_v22  ;;  %v1226_v37 = vcombine.high %v168_v31, %v172_v32  ;;  %v1228_v38 = vcombine.high %v169_v33, %v173_v34  ;;  %v176_v39 = vld [vmem:[#allocation8 + $0x140] sm:$0xff]  ;;  %v177_v41 = vld [vmem:[#allocation8 + $0x148] sm:$0xff]  ;;  %v1225_v43 = vcombine.low %v168_v31, %v172_v32  ;;  %v154_v17 = vld [vmem:[#allocation8 + $0x90] sm:$0xff] }
  0x54   :  { %v180_v40 = vld [vmem:[#allocation8 + $0x160] sm:$0xff]  ;;  %v181_v42 = vld [vmem:[#allocation8 + $0x168] sm:$0xff]  ;;  %v1227_v44 = vcombine.low %v169_v33, %v173_v34  ;;  %v158_v18 = vld [vmem:[#allocation8 + $0xb0] sm:$0xff]  ;;  %v1205_v21 = vcombine.low %v146_v8, %v150_v9  ;;  %v1207_v22 = vcombine.low %v147_v10, %v151_v11 }
  0x55   :  { %v1234_v45 = vcombine.high %v176_v39, %v180_v40  ;;  %v1236_v46 = vcombine.high %v177_v41, %v181_v42  ;;  %v184_v47 = vld [vmem:[#allocation8 + $0x180] sm:$0xff]  ;;  %v185_v49 = vld [vmem:[#allocation8 + $0x188] sm:$0xff]  ;;  %v1233_v51 = vcombine.low %v176_v39, %v180_v40  ;;  %v1235_v52 = vcombine.low %v177_v41, %v181_v42  ;;  %v155_v19 = vld [vmem:[#allocation8 + $0x98] sm:$0xff] }
  0x56   :  { %525 = vmatpush1.bf16.msra.mxu0 %v1209_v27  ;;  %566 = vmatpush1.bf16.msra.mxu1 %v1211_v28  ;;  %v188_v48 = vld [vmem:[#allocation8 + $0x1a0] sm:$0xff]  ;;  %v189_v50 = vld [vmem:[#allocation8 + $0x1a8] sm:$0xff]  ;;  %v159_v20 = vld [vmem:[#allocation8 + $0xb8] sm:$0xff]  ;;  %v1214_v23 = vcombine.high %v154_v17, %v158_v18 }
  0x57   :  { %526 = vmatprep.subr.bf16.mxu0 %v1218_v29  ;;  %567 = vmatprep.subr.bf16.mxu1 %v1220_v30  ;;  %v1242_v53 = vcombine.high %v184_v47, %v188_v48  ;;  %v1244_v54 = vcombine.high %v185_v49, %v189_v50  ;;  %v192_v55 = vld [vmem:[#allocation8 + $0x1c0] sm:$0xff]  ;;  %v193_v57 = vld [vmem:[#allocation8 + $0x1c8] sm:$0xff]  ;;  %v1241_v59 = vcombine.low %v184_v47, %v188_v48  ;;  %v162_v25 = vld [vmem:[#allocation8 + $0xd0] sm:$0xff] }
  0x58   :  { %v196_v56 = vld [vmem:[#allocation8 + $0x1e0] sm:$0xff]  ;;  %v197_v58 = vld [vmem:[#allocation8 + $0x1e8] sm:$0xff]  ;;  %v1243_v60 = vcombine.low %v185_v49, %v189_v50  ;;  %v1216_v24 = vcombine.high %v155_v19, %v159_v20  ;;  %v166_v26 = vld [vmem:[#allocation8 + $0xf0] sm:$0xff]  ;;  %v1213_v29 = vcombine.low %v154_v17, %v158_v18  ;;  %v1215_v30 = vcombine.low %v155_v19, %v159_v20 }
  0x59   :  { %v1250_v61 = vcombine.high %v192_v55, %v196_v56  ;;  %v1252_v62 = vcombine.high %v193_v57, %v197_v58  ;;  %v1249_v4 = vcombine.low %v192_v55, %v196_v56  ;;  %v1251_v5 = vcombine.low %v193_v57, %v197_v58  ;;  %v163_v27 = vld [vmem:[#allocation8 + $0xd8] sm:$0xff]  ;;  %v170_v33 = vld [vmem:[#allocation8 + $0x110] sm:$0xff]  ;;  %v71_v2 = vld [vmem:[#allocation7] sm:$0xff] }
  0x5a   :  { %527 = vmatpush1.bf16.msra.mxu0 %v1217_v35  ;;  %568 = vmatpush1.bf16.msra.mxu1 %v1219_v36  ;;  %v167_v28 = vld [vmem:[#allocation8 + $0xf8] sm:$0xff]  ;;  %v1222_v31 = vcombine.high %v162_v25, %v166_v26  ;;  %v174_v34 = vld [vmem:[#allocation8 + $0x130] sm:$0xff]  ;;  %v75_v3 = vld [vmem:[#allocation7 + $0x20] sm:$0xff] }
  0x5b   :  { %528 = vmatprep.subr.bf16.mxu0 %v1226_v37  ;;  %569 = vmatprep.subr.bf16.mxu1 %v1228_v38  ;;  %v1224_v32 = vcombine.high %v163_v27, %v167_v28  ;;  %v171_v35 = vld [vmem:[#allocation8 + $0x118] sm:$0xff]  ;;  %v1221_v37 = vcombine.low %v162_v25, %v166_v26  ;;  %v1223_v38 = vcombine.low %v163_v27, %v167_v28  ;;  %v178_v41 = vld [vmem:[#allocation8 + $0x150] sm:$0xff]  ;;  %v79_v10 = vld [vmem:[#allocation7 + $0x40] sm:$0xff] }
  0x5c   :  { %v175_v36 = vld [vmem:[#allocation8 + $0x138] sm:$0xff]  ;;  %v1230_v39 = vcombine.high %v170_v33, %v174_v34  ;;  %v182_v42 = vld [vmem:[#allocation8 + $0x170] sm:$0xff]  ;;  %v1258_v8 = vcombine.high %v71_v2, %v75_v3  ;;  %v83_v11 = vld [vmem:[#allocation7 + $0x60] sm:$0xff] }
  0x5d   :  { %v1232_v40 = vcombine.high %v171_v35, %v175_v36  ;;  %v1238_v47 = vcombine.high %v178_v41, %v182_v42  ;;  %v186_v49 = vld [vmem:[#allocation8 + $0x190] sm:$0xff]  ;;  %v1266_v17 = vcombine.high %v79_v10, %v83_v11  ;;  %v87_v19 = vld [vmem:[#allocation7 + $0x80] sm:$0xff] }
  0x5e   :  { %529 = vmatpush1.bf16.msra.mxu0 %v1225_v43  ;;  %570 = vmatpush1.bf16.msra.mxu1 %v1227_v44  ;;  %v179_v43 = vld [vmem:[#allocation8 + $0x158] sm:$0xff]  ;;  %v190_v50 = vld [vmem:[#allocation8 + $0x1b0] sm:$0xff]  ;;  %v91_v20 = vld [vmem:[#allocation7 + $0xa0] sm:$0xff] }
  0x5f   :  { %530 = vmatprep.subr.bf16.mxu0 %v1234_v45  ;;  %571 = vmatprep.subr.bf16.mxu1 %v1236_v46  ;;  %v183_v44 = vld [vmem:[#allocation8 + $0x178] sm:$0xff]  ;;  %v1229_v45 = vcombine.low %v170_v33, %v174_v34  ;;  %v1231_v46 = vcombine.low %v171_v35, %v175_v36  ;;  %v1246_v55 = vcombine.high %v186_v49, %v190_v50  ;;  %v194_v57 = vld [vmem:[#allocation8 + $0x1d0] sm:$0xff]  ;;  %v95_v27 = vld [vmem:[#allocation7 + $0xc0] sm:$0xff] }
  0x60   :  { %v1240_v48 = vcombine.high %v179_v43, %v183_v44  ;;  %v198_v58 = vld [vmem:[#allocation8 + $0x1f0] sm:$0xff]  ;;  %v1274_v25 = vcombine.high %v87_v19, %v91_v20  ;;  %v99_v28 = vld [vmem:[#allocation7 + $0xe0] sm:$0xff]  ;;  %v104_v36 = vld [vmem:[#allocation7 + $0x108] sm:$0xff] }
  0x61   :  { %v1254_v63 = vcombine.high %v194_v57, %v198_v58  ;;  %v103_v34 = vld [vmem:[#allocation7 + $0x100] sm:$0xff] }
  0x62   :  { %531 = vmatpush1.bf16.msra.mxu0 %v1233_v51  ;;  %572 = vmatpush1.bf16.msra.mxu1 %v1235_v52  ;;  %v187_v51 = vld [vmem:[#allocation8 + $0x198] sm:$0xff]  ;;  %v107_v35 = vld [vmem:[#allocation7 + $0x120] sm:$0xff] }
  0x63   :  { %532 = vmatprep.subr.bf16.mxu0 %v1242_v53  ;;  %573 = vmatprep.subr.bf16.mxu1 %v1244_v54  ;;  %v191_v52 = vld [vmem:[#allocation8 + $0x1b8] sm:$0xff]  ;;  %v1237_v53 = vcombine.low %v178_v41, %v182_v42  ;;  %v1239_v54 = vcombine.low %v179_v43, %v183_v44  ;;  %v111_v42 = vld [vmem:[#allocation7 + $0x140] sm:$0xff]  ;;  %v112_v44 = vld [vmem:[#allocation7 + $0x148] sm:$0xff] }
  0x64   :  { %v1248_v56 = vcombine.high %v187_v51, %v191_v52  ;;  %v115_v43 = vld [vmem:[#allocation7 + $0x160] sm:$0xff] }
  0x66   :  { %533 = vmatpush1.bf16.msra.mxu0 %v1241_v59  ;;  %574 = vmatpush1.bf16.msra.mxu1 %v1243_v60  ;;  %v195_v59 = vld [vmem:[#allocation8 + $0x1d8] sm:$0xff] }
  0x67   :  { %534 = vmatprep.subr.bf16.mxu0 %v1250_v61  ;;  %575 = vmatprep.subr.bf16.mxu1 %v1252_v62  ;;  %v199_v60 = vld [vmem:[#allocation8 + $0x1f8] sm:$0xff]  ;;  %v1245_v61 = vcombine.low %v186_v49, %v190_v50  ;;  %v1247_v62 = vcombine.low %v187_v51, %v191_v52  ;;  %v119_v50 = vld [vmem:[#allocation7 + $0x180] sm:$0xff]  ;;  %v120_v52 = vld [vmem:[#allocation7 + $0x188] sm:$0xff] }
  0x68   :  { %v1256_v1 = vcombine.high %v195_v59, %v199_v60  ;;  %v123_v51 = vld [vmem:[#allocation7 + $0x1a0] sm:$0xff] }
  0x6a   :  { %535 = vmatpush1.bf16.msra.mxu0 %v1249_v4  ;;  %576 = vmatpush1.bf16.msra.mxu1 %v1251_v5  ;;  %v72_v4 = vld [vmem:[#allocation7 + $0x8] sm:$0xff] }
  0x6b   :  { %602 = vmatprep.subr.bf16.mxu0 %v1198_v6  ;;  %643 = vmatprep.subr.bf16.mxu1 %v1200_v7  ;;  %v76_v5 = vld [vmem:[#allocation7 + $0x28] sm:$0xff]  ;;  %v1253_v6 = vcombine.low %v194_v57, %v198_v58  ;;  %v1255_v7 = vcombine.low %v195_v59, %v199_v60  ;;  %v127_v58 = vld [vmem:[#allocation7 + $0x1c0] sm:$0xff] }
  0x6c   :  { %v1260_v9 = vcombine.high %v72_v4, %v76_v5  ;;  %v131_v59 = vld [vmem:[#allocation7 + $0x1e0] sm:$0xff]  ;;  %v128_v60 = vld [vmem:[#allocation7 + $0x1c8] sm:$0xff] }
  0x6d   :  { %553 = vmatmul.mubr.bf16.vlgmr.msra.gmra.mrb[0].mxu0 %v1546_v13  ;;  %594 = vmatmul.mubr.bf16.vlgmr.msra.gmra.mrb[0].mxu1 %v1546_v13 }
  0x6e   :  { %603 = vmatpush1.bf16.msra.mxu0 %v1197_v12  ;;  %644 = vmatpush1.bf16.msra.mxu1 %v1199_v14  ;;  %v80_v12 = vld [vmem:[#allocation7 + $0x48] sm:$0xff] }
  0x6f   :  { %604 = vmatprep.subr.bf16.mxu0 %v1206_v15  ;;  %645 = vmatprep.subr.bf16.mxu1 %v1208_v16  ;;  %v84_v14 = vld [vmem:[#allocation7 + $0x68] sm:$0xff]  ;;  %v1257_v15 = vcombine.low %v71_v2, %v75_v3  ;;  %v1259_v16 = vcombine.low %v72_v4, %v76_v5  ;;  %v73_v3 = vld [vmem:[#allocation7 + $0x10] sm:$0xff]  ;;  %v74_v5 = vld [vmem:[#allocation7 + $0x18] sm:$0xff] }
  0x70   :  { %634 = vmatprep.mubr.bf16.mxu0 %v1469_v0  ;;  %675 = vmatprep.mubr.bf16.mxu1 %v1469_v0  ;;  %v1268_v18 = vcombine.high %v80_v12, %v84_v14  ;;  %v77_v4 = vld [vmem:[#allocation7 + $0x30] sm:$0xff] }
  0x72   :  { %605 = vmatpush1.bf16.msra.mxu0 %v1205_v21  ;;  %646 = vmatpush1.bf16.msra.mxu1 %v1207_v22  ;;  %v88_v21 = vld [vmem:[#allocation7 + $0x88] sm:$0xff] }
  0x73   :  { %606 = vmatprep.subr.bf16.mxu0 %v1214_v23  ;;  %647 = vmatprep.subr.bf16.mxu1 %v1216_v24  ;;  %v92_v22 = vld [vmem:[#allocation7 + $0xa8] sm:$0xff]  ;;  %v1265_v23 = vcombine.low %v79_v10, %v83_v11  ;;  %v1267_v24 = vcombine.low %v80_v12, %v84_v14  ;;  %v81_v11 = vld [vmem:[#allocation7 + $0x50] sm:$0xff]  ;;  %v82_v14 = vld [vmem:[#allocation7 + $0x58] sm:$0xff] }
  0x74   :  { %v1276_v26 = vcombine.high %v88_v21, %v92_v22  ;;  %v85_v12 = vld [vmem:[#allocation7 + $0x70] sm:$0xff] }
  0x76   :  { %607 = vmatpush1.bf16.msra.mxu0 %v1213_v29  ;;  %648 = vmatpush1.bf16.msra.mxu1 %v1215_v30  ;;  %v96_v29 = vld [vmem:[#allocation7 + $0xc8] sm:$0xff] }
  0x77   :  { %608 = vmatprep.subr.bf16.mxu0 %v1222_v31  ;;  %649 = vmatprep.subr.bf16.mxu1 %v1224_v32  ;;  %v100_v30 = vld [vmem:[#allocation7 + $0xe8] sm:$0xff]  ;;  %v1273_v31 = vcombine.low %v87_v19, %v91_v20  ;;  %v1282_v32 = vcombine.high %v95_v27, %v99_v28  ;;  %v1270_v19 = vcombine.high %v81_v11, %v85_v12 }
  0x78   :  { %v1284_v33 = vcombine.high %v96_v29, %v100_v30 }
  0x7a   :  { %609 = vmatpush1.bf16.msra.mxu0 %v1221_v37  ;;  %650 = vmatpush1.bf16.msra.mxu1 %v1223_v38  ;;  %v108_v37 = vld [vmem:[#allocation7 + $0x128] sm:$0xff]  ;;  %v1281_v38 = vcombine.low %v95_v27, %v99_v28 }
  0x7b   :  { %610 = vmatprep.subr.bf16.mxu0 %v1230_v39  ;;  %651 = vmatprep.subr.bf16.mxu1 %v1232_v40  ;;  %v1283_v39 = vcombine.low %v96_v29, %v100_v30  ;;  %v1290_v40 = vcombine.high %v103_v34, %v107_v35  ;;  %v1292_v41 = vcombine.high %v104_v36, %v108_v37  ;;  %v97_v29 = vld [vmem:[#allocation7 + $0xd0] sm:$0xff] }
  0x7c   :  { %v101_v30 = vld [vmem:[#allocation7 + $0xf0] sm:$0xff] }
  0x7e   :  { %611 = vmatpush1.bf16.msra.mxu0 %v1229_v45  ;;  %652 = vmatpush1.bf16.msra.mxu1 %v1231_v46  ;;  %v116_v45 = vld [vmem:[#allocation7 + $0x168] sm:$0xff]  ;;  %v1289_v46 = vcombine.low %v103_v34, %v107_v35  ;;  %v1286_v34 = vcombine.high %v97_v29, %v101_v30 }
  0x7f   :  { %612 = vmatprep.subr.bf16.mxu0 %v1238_v47  ;;  %653 = vmatprep.subr.bf16.mxu1 %v1240_v48  ;;  %v1291_v47 = vcombine.low %v104_v36, %v108_v37  ;;  %v1298_v48 = vcombine.high %v111_v42, %v115_v43  ;;  %v1300_v49 = vcombine.high %v112_v44, %v116_v45  ;;  %v105_v36 = vld [vmem:[#allocation7 + $0x110] sm:$0xff] }
  0x80   :  { %v109_v37 = vld [vmem:[#allocation7 + $0x130] sm:$0xff] }
  0x82   :  { %613 = vmatpush1.bf16.msra.mxu0 %v1237_v53  ;;  %654 = vmatpush1.bf16.msra.mxu1 %v1239_v54  ;;  %v124_v53 = vld [vmem:[#allocation7 + $0x1a8] sm:$0xff]  ;;  %v1297_v54 = vcombine.low %v111_v42, %v115_v43  ;;  %v1294_v42 = vcombine.high %v105_v36, %v109_v37  ;;  %v113_v43 = vld [vmem:[#allocation7 + $0x150] sm:$0xff] }
  0x83   :  { %614 = vmatprep.subr.bf16.mxu0 %v1246_v55  ;;  %655 = vmatprep.subr.bf16.mxu1 %v1248_v56  ;;  %v1299_v55 = vcombine.low %v112_v44, %v116_v45  ;;  %v1306_v56 = vcombine.high %v119_v50, %v123_v51  ;;  %v1308_v57 = vcombine.high %v120_v52, %v124_v53  ;;  %v117_v44 = vld [vmem:[#allocation7 + $0x170] sm:$0xff]  ;;  %v114_v45 = vld [vmem:[#allocation7 + $0x158] sm:$0xff] }
  0x86   :  { %615 = vmatpush1.bf16.msra.mxu0 %v1245_v61  ;;  %656 = vmatpush1.bf16.msra.mxu1 %v1247_v62  ;;  %v132_v61 = vld [vmem:[#allocation7 + $0x1e8] sm:$0xff]  ;;  %v1305_v62 = vcombine.low %v119_v50, %v123_v51  ;;  %v121_v51 = vld [vmem:[#allocation7 + $0x190] sm:$0xff] }
  0x87   :  { %616 = vmatprep.subr.bf16.mxu0 %v1254_v63  ;;  %657 = vmatprep.subr.bf16.mxu1 %v1256_v1  ;;  %v1307_v63 = vcombine.low %v120_v52, %v124_v53  ;;  %v1314_v1 = vcombine.high %v127_v58, %v131_v59  ;;  %v1316_v2 = vcombine.high %v128_v60, %v132_v61  ;;  %v125_v52 = vld [vmem:[#allocation7 + $0x1b0] sm:$0xff]  ;;  %v122_v53 = vld [vmem:[#allocation7 + $0x198] sm:$0xff] }
  0x8a   :  { %617 = vmatpush1.bf16.msra.mxu0 %v1253_v6  ;;  %658 = vmatpush1.bf16.msra.mxu1 %v1255_v7  ;;  %v78_v6 = vld [vmem:[#allocation7 + $0x38] sm:$0xff]  ;;  %v1313_v7 = vcombine.low %v127_v58, %v131_v59  ;;  %v129_v59 = vld [vmem:[#allocation7 + $0x1d0] sm:$0xff] }
  0x8b   :  { %1004 = vmatprep.subr.bf16.mxu0 %v1258_v8  ;;  %1045 = vmatprep.subr.bf16.mxu1 %v1260_v9  ;;  %v1315_v8 = vcombine.low %v128_v60, %v132_v61  ;;  %v1262_v9 = vcombine.high %v73_v3, %v77_v4  ;;  %v1264_v10 = vcombine.high %v74_v5, %v78_v6  ;;  %v133_v60 = vld [vmem:[#allocation7 + $0x1f0] sm:$0xff]  ;;  %v130_v61 = vld [vmem:[#allocation7 + $0x1d8] sm:$0xff] }
  0x8d   :  { %635 = vmatmul.mubr.bf16.vlgmr.msra.gmra.mrb[4].mxu0 %v1546_v13  ;;  %676 = vmatmul.mubr.bf16.vlgmr.msra.gmra.mrb[4].mxu1 %v1546_v13  ;;  %v1275_v13 = vcombine.low %v88_v21, %v92_v22  ;;  %v89_v21 = vld [vmem:[#allocation7 + $0x90] sm:$0xff] }
  0x8e   :  { %1005 = vmatpush1.bf16.msra.mxu0 %v1257_v15  ;;  %1046 = vmatpush1.bf16.msra.mxu1 %v1259_v16  ;;  %v86_v15 = vld [vmem:[#allocation7 + $0x78] sm:$0xff]  ;;  %v93_v22 = vld [vmem:[#allocation7 + $0xb0] sm:$0xff] }
  0x8f   :  { %1006 = vmatprep.subr.bf16.mxu0 %v1266_v17  ;;  %1047 = vmatprep.subr.bf16.mxu1 %v1268_v18  ;;  %v1556_v16 = vld [vmem:[#allocation2] sm:$0xf]  ;;  %v1261_v17 = vcombine.low %v73_v3, %v77_v4  ;;  %v1263_v18 = vcombine.low %v74_v5, %v78_v6  ;;  %v1272_v20 = vcombine.high %v82_v14, %v86_v15 }
  0x90   :  { %1036 = vmatprep.mubr.bf16.mxu0 %v1469_v0  ;;  %1077 = vmatprep.mubr.bf16.mxu1 %v1469_v0  ;;  %v1278_v27 = vcombine.high %v89_v21, %v93_v22  ;;  %v1317_v4 = vcombine.low %v129_v59, %v133_v60 }
  0x92   :  { %1007 = vmatpush1.bf16.msra.mxu0 %v1265_v23  ;;  %1048 = vmatpush1.bf16.msra.mxu1 %v1267_v24  ;;  %v90_v23 = vld [vmem:[#allocation7 + $0x98] sm:$0xff] }
  0x93   :  { %1008 = vmatprep.subr.bf16.mxu0 %v1274_v25  ;;  %1049 = vmatprep.subr.bf16.mxu1 %v1276_v26  ;;  %v94_v24 = vld [vmem:[#allocation7 + $0xb8] sm:$0xff]  ;;  %v1269_v25 = vcombine.low %v81_v11, %v85_v12  ;;  %v1271_v26 = vcombine.low %v82_v14, %v86_v15 }
  0x94   :  { %v1280_v28 = vcombine.high %v90_v23, %v94_v24 }
  0x96   :  { %1009 = vmatpush1.bf16.msra.mxu0 %v1273_v31  ;;  %1050 = vmatpush1.bf16.msra.mxu1 %v1275_v13  ;;  %v98_v31 = vld [vmem:[#allocation7 + $0xd8] sm:$0xff] }
  0x97   :  { %1010 = vmatprep.subr.bf16.mxu0 %v1282_v32  ;;  %1051 = vmatprep.subr.bf16.mxu1 %v1284_v33  ;;  %v102_v13 = vld [vmem:[#allocation7 + $0xf8] sm:$0xff]  ;;  %v1277_v32 = vcombine.low %v89_v21, %v93_v22  ;;  %v1279_v33 = vcombine.low %v90_v23, %v94_v24 }
  0x98   :  { %v1288_v35 = vcombine.high %v98_v31, %v102_v13 }
  0x9a   :  { %1011 = vmatpush1.bf16.msra.mxu0 %v1281_v38  ;;  %1052 = vmatpush1.bf16.msra.mxu1 %v1283_v39  ;;  %v106_v38 = vld [vmem:[#allocation7 + $0x118] sm:$0xff] }
  0x9b   :  { %1012 = vmatprep.subr.bf16.mxu0 %v1290_v40  ;;  %1053 = vmatprep.subr.bf16.mxu1 %v1292_v41  ;;  %v110_v39 = vld [vmem:[#allocation7 + $0x138] sm:$0xff]  ;;  %v1285_v40 = vcombine.low %v97_v29, %v101_v30  ;;  %v1287_v41 = vcombine.low %v98_v31, %v102_v13 }
  0x9e   :  { %1013 = vmatpush1.bf16.msra.mxu0 %v1289_v46  ;;  %1054 = vmatpush1.bf16.msra.mxu1 %v1291_v47  ;;  %v118_v46 = vld [vmem:[#allocation7 + $0x178] sm:$0xff]  ;;  %v1293_v47 = vcombine.low %v105_v36, %v109_v37 }
  0x9f   :  { %1014 = vmatprep.subr.bf16.mxu0 %v1298_v48  ;;  %1055 = vmatprep.subr.bf16.mxu1 %v1300_v49  ;;  %v1295_v48 = vcombine.low %v106_v38, %v110_v39  ;;  %v1302_v49 = vcombine.high %v113_v43, %v117_v44  ;;  %v1304_v50 = vcombine.high %v114_v45, %v118_v46 }
  0xa2   :  { %1015 = vmatpush1.bf16.msra.mxu0 %v1297_v54  ;;  %1056 = vmatpush1.bf16.msra.mxu1 %v1299_v55  ;;  %v126_v54 = vld [vmem:[#allocation7 + $0x1b8] sm:$0xff]  ;;  %v1301_v55 = vcombine.low %v113_v43, %v117_v44 }
  0xa3   :  { %1016 = vmatprep.subr.bf16.mxu0 %v1306_v56  ;;  %1057 = vmatprep.subr.bf16.mxu1 %v1308_v57  ;;  %v1303_v56 = vcombine.low %v114_v45, %v118_v46  ;;  %v1310_v57 = vcombine.high %v121_v51, %v125_v52  ;;  %v1312_v58 = vcombine.high %v122_v53, %v126_v54 }
  0xa6   :  { %1017 = vmatpush1.bf16.msra.mxu0 %v1305_v62  ;;  %1058 = vmatpush1.bf16.msra.mxu1 %v1307_v63  ;;  %v134_v62 = vld [vmem:[#allocation7 + $0x1f8] sm:$0xff]  ;;  %v1309_v63 = vcombine.low %v121_v51, %v125_v52 }
  0xa7   :  { %1018 = vmatprep.subr.bf16.mxu0 %v1314_v1  ;;  %1059 = vmatprep.subr.bf16.mxu1 %v1316_v2  ;;  %v1311_v1 = vcombine.low %v122_v53, %v126_v54  ;;  %v1318_v2 = vcombine.high %v129_v59, %v133_v60  ;;  %v1320_v3 = vcombine.high %v130_v61, %v134_v62 }
  0xa8   :  { %v1319_v5 = vcombine.low %v130_v61, %v134_v62 }
  0xaa   :  { %1019 = vmatpush1.bf16.msra.mxu0 %v1313_v7  ;;  %1060 = vmatpush1.bf16.msra.mxu1 %v1315_v8 }
  0xab   :  { %1086 = vmatprep.subr.bf16.mxu0 %v1262_v9  ;;  %1127 = vmatprep.subr.bf16.mxu1 %v1264_v10 }
  0xad   :  { %1037 = vmatmul.mubr.bf16.vlgmr.msra.gmra.mrb[0].mxu0 %v1556_v16  ;;  %1078 = vmatmul.mubr.bf16.vlgmr.msra.gmra.mrb[0].mxu1 %v1556_v16 }
  0xae   :  { %1087 = vmatpush1.bf16.msra.mxu0 %v1261_v17  ;;  %1128 = vmatpush1.bf16.msra.mxu1 %v1263_v18 }
  0xaf   :  { %1088 = vmatprep.subr.bf16.mxu0 %v1270_v19  ;;  %1129 = vmatprep.subr.bf16.mxu1 %v1272_v20 }
  0xb0   :  { %1118 = vmatprep.mubr.bf16.mxu0 %v1469_v0  ;;  %1159 = vmatprep.mubr.bf16.mxu1 %v1469_v0  ;;  %v1296_v0 = vcombine.high %v106_v38, %v110_v39 }
  0xb2   :  { %1089 = vmatpush1.bf16.msra.mxu0 %v1269_v25  ;;  %1130 = vmatpush1.bf16.msra.mxu1 %v1271_v26 }
  0xb3   :  { %1090 = vmatprep.subr.bf16.mxu0 %v1278_v27  ;;  %1131 = vmatprep.subr.bf16.mxu1 %v1280_v28 }
  0xb6   :  { %1091 = vmatpush1.bf16.msra.mxu0 %v1277_v32  ;;  %1132 = vmatpush1.bf16.msra.mxu1 %v1279_v33 }
  0xb7   :  { %1092 = vmatprep.subr.bf16.mxu0 %v1286_v34  ;;  %1133 = vmatprep.subr.bf16.mxu1 %v1288_v35 }
  0xba   :  { %1093 = vmatpush1.bf16.msra.mxu0 %v1285_v40  ;;  %1134 = vmatpush1.bf16.msra.mxu1 %v1287_v41 }
  0xbb   :  { %1094 = vmatprep.subr.bf16.mxu0 %v1294_v42  ;;  %1135 = vmatprep.subr.bf16.mxu1 %v1296_v0 }
  0xbe   :  { %1095 = vmatpush1.bf16.msra.mxu0 %v1293_v47  ;;  %1136 = vmatpush1.bf16.msra.mxu1 %v1295_v48 }
  0xbf   :  { %1096 = vmatprep.subr.bf16.mxu0 %v1302_v49  ;;  %1137 = vmatprep.subr.bf16.mxu1 %v1304_v50 }
  0xc2   :  { %1097 = vmatpush1.bf16.msra.mxu0 %v1301_v55  ;;  %1138 = vmatpush1.bf16.msra.mxu1 %v1303_v56 }
  0xc3   :  { %1098 = vmatprep.subr.bf16.mxu0 %v1310_v57  ;;  %1139 = vmatprep.subr.bf16.mxu1 %v1312_v58 }
  0xc6   :  { %1099 = vmatpush1.bf16.msra.mxu0 %v1309_v63  ;;  %1140 = vmatpush1.bf16.msra.mxu1 %v1311_v1 }
  0xc7   :  { %1100 = vmatprep.subr.bf16.mxu0 %v1318_v2  ;;  %1141 = vmatprep.subr.bf16.mxu1 %v1320_v3 }
  0xca   :  { %1101 = vmatpush1.bf16.msra.mxu0 %v1317_v4  ;;  %1142 = vmatpush1.bf16.msra.mxu1 %v1319_v5 }
  0xcd   :  { %1119 = vmatmul.mubr.bf16.vlgmr.msra.gmra.mrb[4].mxu0 %v1556_v16  ;;  %1160 = vmatmul.mubr.bf16.vlgmr.msra.gmra.mrb[4].mxu1 %v1556_v16 }
 0x180   :  { %v1038_v6 = vpop.f32.mrb[0].mxu0  ;;  %v1079_v7 = vpop.f32.mrb[0].mxu1 }
 0x181   :  { %1168 = vst [vmem:[#allocation10] sm:$0xff] %v1038_v6  ;;  %v1040_v8 = vpop.f32.mrb[1].mxu0  ;;  %1170 = vst [vmem:[#allocation10 + $0x10] sm:$0xff] %v1079_v7  ;;  %v1081_v9 = vpop.f32.mrb[1].mxu1 }
 0x182   :  { %1169 = vst [vmem:[#allocation10 + $0x8] sm:$0xff] %v1040_v8  ;;  %v1042_v10 = vpop.f32.mrb[2].mxu0  ;;  %1171 = vst [vmem:[#allocation10 + $0x18] sm:$0xff] %v1081_v9  ;;  %v1083_v11 = vpop.f32.mrb[2].mxu1 }
 0x183   :  { %v1043_v12 = vpop.f32.mrb[3].mxu0  ;;  %v1084_v14 = vpop.f32.mrb[3].mxu1 }
 0x1a0   :  { %v1120_v15 = vpop.f32.mrb[4].mxu0  ;;  %v1161_v17 = vpop.f32.mrb[4].mxu1 }
 0x1a1   :  { %1172 = vst [vmem:[#allocation10 + $0x20] sm:$0xff] %v1120_v15  ;;  %v1122_v18 = vpop.f32.mrb[5].mxu0  ;;  %1174 = vst [vmem:[#allocation10 + $0x30] sm:$0xff] %v1161_v17  ;;  %v1163_v16 = vpop.f32.mrb[5].mxu1 }
 0x1a2   :  { %1173 = vst [vmem:[#allocation10 + $0x28] sm:$0xff] %v1122_v18  ;;  %v1124_v19 = vpop.f32.mrb[6].mxu0  ;;  %1175 = vst [vmem:[#allocation10 + $0x38] sm:$0xff] %v1163_v16  ;;  %v1165_v20 = vpop.f32.mrb[6].mxu1 }
 0x1a3   :  { %v1125_v21 = vpop.f32.mrb[7].mxu0  ;;  %v1166_v22 = vpop.f32.mrb[7].mxu1 }
 0x1a4   :  { %1444 = shalt.err (!%p1441_p8)
}
 0x1a5   :  { %s1445_s13 = scalar_lea.hbm %s1580_s4, 1024 }
 0x1a6   :  { %p1446_p9 = scmp.ne.s32.totalorder %s1580_s4, %s1445_s13  ;;  %p1449_p10 = scmp.lt.u32.totalorder %s1445_s13, %s1580_s4 }
 0x1a8   :  { %p1451_p11 = pnand %p1449_p10, %p1446_p9 }
 0x1aa   :  { %1454 = shalt.err (!%p1451_p11)
}
 0x1ab   :  { %1185 = dma.vmem_to_hbm [thread:$0]  %s1183_s10, 1024, %s1580_s4, [#allocation4]  }
 0x1ac   :  { %1461 = dma.done.wait [#allocation4], 1024  }
 0x1ad   :  { %1462 = vsyncadd [#allocation4], 4294966272 }
 0x1ae   :  { %1189 = vsyncpa [#allocation3], 1 }
 0x1af   :  { %1190 = vsyncpa [#allocation6], 1 }
 0x1b0   :  { %1191 = vsyncpa [#allocation9], 1 }
 0x1b1   :  { %1192 = vsyncpa [#allocation4], 1 }

// kernel: tpu_custom_call.1
= control target key start
LH: loop header
LB: loop body
LE: loop exit
PB: predicated region body
PF: predicated region fallthrough
CT: control target
= control target key end

     0   :  { %9 = vsyncpa [#allocation3], 0  ;;  %s1576_s0 = inlined_call_operand.hbm [shape: bf16[8,128], index: 0, kind: input, shape index: {}]   ;;  %s1577_s1 = inlined_call_operand.hbm [shape: bf16[8,128], index: 1, kind: input, shape index: {}]   ;;  %s1578_s2 = inlined_call_operand.hbm [shape: bf16[128,1024], index: 2, kind: input, shape index: {}]   ;;  %s1579_s3 = inlined_call_operand.hbm [shape: bf16[128,1024], index: 3, kind: input, shape index: {}]   ;;  %s1580_s4 = inlined_call_operand.hbm [shape: f32[8,1024], index: 4, kind: output, shape index: {}]  }
   0x1   :  { %10 = vsyncpa [#allocation6], 0 }
   0x2   :  { %11 = vsyncpa [#allocation9], 0 }
   0x3   :  { %12 = vsyncpa [#allocation4], 0  ;;  %s1463_s15 = smov [#allocation5]   ;;  %s1464_s17 = smov [#allocation2]  }
   0x4   :  { %s29_s16 = sshll.u32 %s1463_s15, 4  ;;  %s19_s18 = sshll.u32 %s1464_s17, 4  ;;  %s30_s16 = int_to_ptr.vmem [resolvable:$true] %s29_s16  ;;  %s20_s18 = int_to_ptr.vmem [resolvable:$true] %s19_s18 }
   0x5   :  { %s1345_s21 = scalar_lea.hbm %s1577_s1, 64 }
   0x6   :  { %p1346_p0 = scmp.ne.s32.totalorder %s1577_s1, %s1345_s21  ;;  %p1349_p1 = scmp.lt.u32.totalorder %s1345_s21, %s1577_s1 }
   0x8   :  { %p1351_p2 = pnand %p1349_p1, %p1346_p0 }
   0xa   :  { %1354 = shalt.err (!%p1351_p2)
}
   0xb   :  { %s1355_s26 = scalar_lea.vmem %s30_s16, 64  ;;  %p1360_p4 = scmp.lt.s32.totalorder %s30_s16, %s30_s16 }
   0xc   :  { %p1356_p3 = scmp.ne.s32.totalorder %s30_s16, %s1355_s26  ;;  %p1361_p5 = scmp.lt.s32.totalorder %s1355_s26, %s1355_s26 }
   0xe   :  { %p1362_p6 = por %p1361_p5, %p1360_p4 }
  0x10   :  { %p1363_p7 = pnand %p1362_p6, %p1356_p3 }
  0x12   :  { %1366 = shalt.err (!%p1363_p7)
}
  0x13   :  { %32 = dma.hbm_to_vmem [thread:$0]  %s1577_s1, 64, %s30_s16, [#allocation6]  }
  0x14   :  { %s1367_s5 = scalar_lea.hbm %s1576_s0, 64 }
  0x15   :  { %p1368_p8 = scmp.ne.s32.totalorder %s1576_s0, %s1367_s5  ;;  %p1371_p9 = scmp.lt.u32.totalorder %s1367_s5, %s1576_s0 }
  0x17   :  { %p1373_p10 = pnand %p1371_p9, %p1368_p8 }
  0x19   :  { %1376 = shalt.err (!%p1373_p10)
}
  0x1a   :  { %s1377_s10 = scalar_lea.vmem %s20_s18, 64  ;;  %p1382_p12 = scmp.lt.s32.totalorder %s20_s18, %s20_s18 }
  0x1b   :  { %p1378_p11 = scmp.ne.s32.totalorder %s20_s18, %s1377_s10  ;;  %p1383_p13 = scmp.lt.s32.totalorder %s1377_s10, %s1377_s10 }
  0x1d   :  { %p1384_p0 = por %p1383_p13, %p1382_p12 }
  0x1f   :  { %p1385_p1 = pnand %p1384_p0, %p1378_p11 }
  0x21   :  { %1388 = shalt.err (!%p1385_p1)
}
  0x22   :  { %22 = dma.hbm_to_vmem [thread:$0]  %s1576_s0, 64, %s20_s18, [#allocation3]  }
  0x23   :  { %s1465_s12 = smov [#allocation7]   ;;  %s1389_s16 = scalar_lea.hbm %s1578_s2, 8192 }
  0x24   :  { %s38_s13 = sshll.u32 %s1465_s12, 4  ;;  %p1390_p2 = scmp.ne.s32.totalorder %s1578_s2, %s1389_s16  ;;  %s39_s13 = int_to_ptr.vmem [resolvable:$true] %s38_s13 }
  0x25   :  { %p1393_p3 = scmp.lt.u32.totalorder %s1389_s16, %s1578_s2 }
  0x27   :  { %p1395_p4 = pnand %p1393_p3, %p1390_p2 }
  0x29   :  { %1398 = shalt.err (!%p1395_p4)
}
  0x2a   :  { %s1399_s22 = scalar_lea.vmem %s39_s13, 8192  ;;  %p1404_p6 = scmp.lt.s32.totalorder %s39_s13, %s39_s13 }
  0x2b   :  { %p1400_p5 = scmp.ne.s32.totalorder %s39_s13, %s1399_s22  ;;  %p1405_p7 = scmp.lt.s32.totalorder %s1399_s22, %s1399_s22 }
  0x2d   :  { %p1406_p8 = por %p1405_p7, %p1404_p6 }
  0x2f   :  { %p1407_p9 = pnand %p1406_p8, %p1400_p5 }
  0x31   :  { %1410 = shalt.err (!%p1407_p9)
}
  0x32   :  { %s1466_s0 = smov 512   ;;  %s1467_s18 = smov 32  }
  0x33   :  { %44 = dma.hbm_to_vmem [thread:$0]  %s1578_s2, 8192, %s39_s13, [#allocation6], %s1466_s0, %s1466_s0, %s1467_s18  }
  0x34   :  { %s1468_s25 = smov [#allocation8]   ;;  %s1411_s29 = scalar_lea.hbm %s1579_s3, 8192 }
  0x35   :  { %s50_s26 = sshll.u32 %s1468_s25, 4  ;;  %p1412_p10 = scmp.ne.s32.totalorder %s1579_s3, %s1411_s29  ;;  %s51_s26 = int_to_ptr.vmem [resolvable:$true] %s50_s26 }
  0x36   :  { %p1415_p11 = scmp.lt.u32.totalorder %s1411_s29, %s1579_s3 }
  0x38   :  { %p1417_p12 = pnand %p1415_p11, %p1412_p10 }
  0x3a   :  { %1420 = shalt.err (!%p1417_p12)
}
  0x3b   :  { %s1421_s8 = scalar_lea.vmem %s51_s26, 8192  ;;  %p1426_p0 = scmp.lt.s32.totalorder %s51_s26, %s51_s26 }
  0x3c   :  { %p1422_p13 = scmp.ne.s32.totalorder %s51_s26, %s1421_s8  ;;  %p1427_p1 = scmp.lt.s32.totalorder %s1421_s8, %s1421_s8 }
  0x3e   :  { %p1428_p2 = por %p1427_p1, %p1426_p0 }
  0x40   :  { %p1429_p3 = pnand %p1428_p2, %p1422_p13 }
  0x42   :  { %1432 = shalt.err (!%p1429_p3)
}
  0x43   :  { %56 = dma.hbm_to_vmem [thread:$0]  %s1579_s3, 8192, %s51_s26, [#allocation9], %s1466_s0, %s1466_s0, %s1467_s18  }
  0x44   :  { %1455 = dma.done.wait [#allocation3], 64  }
  0x45   :  { %1456 = vsyncadd [#allocation3], 4294967232 }
  0x46   :  { %1457 = dma.done.wait [#allocation6], 8256  }
  0x47   :  { %1458 = vsyncadd [#allocation6], 4294959040 }
  0x48   :  { %1459 = dma.done.wait [#allocation9], 8192  }
  0x49   :  { %1460 = vsyncadd [#allocation9], 4294959104  ;;  %v1469_v0 = vmov 0   ;;  %v136_v1 = vld [vmem:[#allocation8] sm:$0xff]  ;;  %v137_v3 = vld [vmem:[#allocation8 + $0x8] sm:$0xff]  ;;  %s1470_s3 = smov [#allocation10]  }
  0x4a   :  { %552 = vmatprep.mubr.bf16.mxu0 %v1469_v0  ;;  %593 = vmatprep.mubr.bf16.mxu1 %v1469_v0  ;;  %v140_v2 = vld [vmem:[#allocation8 + $0x20] sm:$0xff]  ;;  %v141_v5 = vld [vmem:[#allocation8 + $0x28] sm:$0xff]  ;;  %v138_v63 = vld [vmem:[#allocation8 + $0x10] sm:$0xff]  ;;  %s1182_s10 = sshll.u32 %s1470_s3, 4  ;;  %s1183_s10 = int_to_ptr.vmem [resolvable:$true] %s1182_s10 }
  0x4b   :  { %v1194_v4 = vcombine.high %v136_v1, %v140_v2  ;;  %v1193_v6 = vcombine.low %v136_v1, %v140_v2  ;;  %v144_v7 = vld [vmem:[#allocation8 + $0x40] sm:$0xff]  ;;  %v1196_v9 = vcombine.high %v137_v3, %v141_v5  ;;  %v1195_v10 = vcombine.low %v137_v3, %v141_v5  ;;  %v145_v12 = vld [vmem:[#allocation8 + $0x48] sm:$0xff]  ;;  %v142_v1 = vld [vmem:[#allocation8 + $0x30] sm:$0xff]  ;;  %s1433_s1 = scalar_lea.vmem %s1183_s10, 1024  ;;  %p1438_p5 = scmp.lt.s32.totalorder %s1183_s10, %s1183_s10 }
  0x4c   :  { %v148_v8 = vld [vmem:[#allocation8 + $0x60] sm:$0xff]  ;;  %v149_v13 = vld [vmem:[#allocation8 + $0x68] sm:$0xff]  ;;  %v139_v2 = vld [vmem:[#allocation8 + $0x18] sm:$0xff]  ;;  %p1434_p4 = scmp.ne.s32.totalorder %s1183_s10, %s1433_s1  ;;  %p1439_p6 = scmp.lt.s32.totalorder %s1433_s1, %s1433_s1 }
  0x4d   :  { %v1202_v11 = vcombine.high %v144_v7, %v148_v8  ;;  %v152_v14 = vld [vmem:[#allocation8 + $0x80] sm:$0xff]  ;;  %520 = vmatprep.subr.bf16.mxu0 %v1194_v4  ;;  %v1204_v15 = vcombine.high %v145_v12, %v149_v13  ;;  %v153_v17 = vld [vmem:[#allocation8 + $0x88] sm:$0xff]  ;;  %561 = vmatprep.subr.bf16.mxu1 %v1196_v9  ;;  %v1201_v19 = vcombine.low %v144_v7, %v148_v8  ;;  %v143_v3 = vld [vmem:[#allocation8 + $0x38] sm:$0xff] }
  0x4e   :  { %v156_v16 = vld [vmem:[#allocation8 + $0xa0] sm:$0xff]  ;;  %v157_v18 = vld [vmem:[#allocation8 + $0xa8] sm:$0xff]  ;;  %521 = vmatpush1.bf16.msra.mxu0 %v1193_v6  ;;  %562 = vmatpush1.bf16.msra.mxu1 %v1195_v10  ;;  %v1203_v20 = vcombine.low %v145_v12, %v149_v13  ;;  %v1198_v6 = vcombine.high %v138_v63, %v142_v1  ;;  %v1200_v7 = vcombine.high %v139_v2, %v143_v3  ;;  %v146_v8 = vld [vmem:[#allocation8 + $0x50] sm:$0xff]  ;;  %p1440_p7 = por %p1439_p6, %p1438_p5 }
  0x4f   :  { %522 = vmatprep.subr.bf16.mxu0 %v1202_v11  ;;  %v1210_v21 = vcombine.high %v152_v14, %v156_v16  ;;  %563 = vmatprep.subr.bf16.mxu1 %v1204_v15  ;;  %v1212_v22 = vcombine.high %v153_v17, %v157_v18  ;;  %v160_v23 = vld [vmem:[#allocation8 + $0xc0] sm:$0xff]  ;;  %v161_v25 = vld [vmem:[#allocation8 + $0xc8] sm:$0xff]  ;;  %v1209_v27 = vcombine.low %v152_v14, %v156_v16  ;;  %v150_v9 = vld [vmem:[#allocation8 + $0x70] sm:$0xff] }
  0x50   :  { %v164_v24 = vld [vmem:[#allocation8 + $0xe0] sm:$0xff]  ;;  %v165_v26 = vld [vmem:[#allocation8 + $0xe8] sm:$0xff]  ;;  %v1211_v28 = vcombine.low %v153_v17, %v157_v18  ;;  %v147_v10 = vld [vmem:[#allocation8 + $0x58] sm:$0xff]  ;;  %v1197_v12 = vcombine.low %v138_v63, %v142_v1  ;;  %v1199_v14 = vcombine.low %v139_v2, %v143_v3  ;;  %v1206_v15 = vcombine.high %v146_v8, %v150_v9  ;;  %p1441_p8 = pnand %p1440_p7, %p1434_p4 }
  0x51   :  { %v1218_v29 = vcombine.high %v160_v23, %v164_v24  ;;  %v1220_v30 = vcombine.high %v161_v25, %v165_v26  ;;  %v168_v31 = vld [vmem:[#allocation8 + $0x100] sm:$0xff]  ;;  %v169_v33 = vld [vmem:[#allocation8 + $0x108] sm:$0xff]  ;;  %v1217_v35 = vcombine.low %v160_v23, %v164_v24  ;;  %v1219_v36 = vcombine.low %v161_v25, %v165_v26  ;;  %v151_v11 = vld [vmem:[#allocation8 + $0x78] sm:$0xff] }
  0x52   :  { %523 = vmatpush1.bf16.msra.mxu0 %v1201_v19  ;;  %564 = vmatpush1.bf16.msra.mxu1 %v1203_v20  ;;  %v172_v32 = vld [vmem:[#allocation8 + $0x120] sm:$0xff]  ;;  %v173_v34 = vld [vmem:[#allocation8 + $0x128] sm:$0xff]  ;;  %v1546_v13 = vld [vmem:[#allocation5] sm:$0xf]  ;;  %v1208_v16 = vcombine.high %v147_v10, %v151_v11 }
  0x53   :  { %524 = vmatprep.subr.bf16.mxu0 %v1210_v21  ;;  %565 = vmatprep.subr.bf16.mxu1 %v1212_v22  ;;  %v1226_v37 = vcombine.high %v168_v31, %v172_v32  ;;  %v1228_v38 = vcombine.high %v169_v33, %v173_v34  ;;  %v176_v39 = vld [vmem:[#allocation8 + $0x140] sm:$0xff]  ;;  %v177_v41 = vld [vmem:[#allocation8 + $0x148] sm:$0xff]  ;;  %v1225_v43 = vcombine.low %v168_v31, %v172_v32  ;;  %v154_v17 = vld [vmem:[#allocation8 + $0x90] sm:$0xff] }
  0x54   :  { %v180_v40 = vld [vmem:[#allocation8 + $0x160] sm:$0xff]  ;;  %v181_v42 = vld [vmem:[#allocation8 + $0x168] sm:$0xff]  ;;  %v1227_v44 = vcombine.low %v169_v33, %v173_v34  ;;  %v158_v18 = vld [vmem:[#allocation8 + $0xb0] sm:$0xff]  ;;  %v1205_v21 = vcombine.low %v146_v8, %v150_v9  ;;  %v1207_v22 = vcombine.low %v147_v10, %v151_v11 }
  0x55   :  { %v1234_v45 = vcombine.high %v176_v39, %v180_v40  ;;  %v1236_v46 = vcombine.high %v177_v41, %v181_v42  ;;  %v184_v47 = vld [vmem:[#allocation8 + $0x180] sm:$0xff]  ;;  %v185_v49 = vld [vmem:[#allocation8 + $0x188] sm:$0xff]  ;;  %v1233_v51 = vcombine.low %v176_v39, %v180_v40  ;;  %v1235_v52 = vcombine.low %v177_v41, %v181_v42  ;;  %v155_v19 = vld [vmem:[#allocation8 + $0x98] sm:$0xff] }
  0x56   :  { %525 = vmatpush1.bf16.msra.mxu0 %v1209_v27  ;;  %566 = vmatpush1.bf16.msra.mxu1 %v1211_v28  ;;  %v188_v48 = vld [vmem:[#allocation8 + $0x1a0] sm:$0xff]  ;;  %v189_v50 = vld [vmem:[#allocation8 + $0x1a8] sm:$0xff]  ;;  %v159_v20 = vld [vmem:[#allocation8 + $0xb8] sm:$0xff]  ;;  %v1214_v23 = vcombine.high %v154_v17, %v158_v18 }
  0x57   :  { %526 = vmatprep.subr.bf16.mxu0 %v1218_v29  ;;  %567 = vmatprep.subr.bf16.mxu1 %v1220_v30  ;;  %v1242_v53 = vcombine.high %v184_v47, %v188_v48  ;;  %v1244_v54 = vcombine.high %v185_v49, %v189_v50  ;;  %v192_v55 = vld [vmem:[#allocation8 + $0x1c0] sm:$0xff]  ;;  %v193_v57 = vld [vmem:[#allocation8 + $0x1c8] sm:$0xff]  ;;  %v1241_v59 = vcombine.low %v184_v47, %v188_v48  ;;  %v162_v25 = vld [vmem:[#allocation8 + $0xd0] sm:$0xff] }
  0x58   :  { %v196_v56 = vld [vmem:[#allocation8 + $0x1e0] sm:$0xff]  ;;  %v197_v58 = vld [vmem:[#allocation8 + $0x1e8] sm:$0xff]  ;;  %v1243_v60 = vcombine.low %v185_v49, %v189_v50  ;;  %v1216_v24 = vcombine.high %v155_v19, %v159_v20  ;;  %v166_v26 = vld [vmem:[#allocation8 + $0xf0] sm:$0xff]  ;;  %v1213_v29 = vcombine.low %v154_v17, %v158_v18  ;;  %v1215_v30 = vcombine.low %v155_v19, %v159_v20 }
  0x59   :  { %v1250_v61 = vcombine.high %v192_v55, %v196_v56  ;;  %v1252_v62 = vcombine.high %v193_v57, %v197_v58  ;;  %v1249_v4 = vcombine.low %v192_v55, %v196_v56  ;;  %v1251_v5 = vcombine.low %v193_v57, %v197_v58  ;;  %v163_v27 = vld [vmem:[#allocation8 + $0xd8] sm:$0xff]  ;;  %v170_v33 = vld [vmem:[#allocation8 + $0x110] sm:$0xff]  ;;  %v71_v2 = vld [vmem:[#allocation7] sm:$0xff] }
  0x5a   :  { %527 = vmatpush1.bf16.msra.mxu0 %v1217_v35  ;;  %568 = vmatpush1.bf16.msra.mxu1 %v1219_v36  ;;  %v167_v28 = vld [vmem:[#allocation8 + $0xf8] sm:$0xff]  ;;  %v1222_v31 = vcombine.high %v162_v25, %v166_v26  ;;  %v174_v34 = vld [vmem:[#allocation8 + $0x130] sm:$0xff]  ;;  %v75_v3 = vld [vmem:[#allocation7 + $0x20] sm:$0xff] }
  0x5b   :  { %528 = vmatprep.subr.bf16.mxu0 %v1226_v37  ;;  %569 = vmatprep.subr.bf16.mxu1 %v1228_v38  ;;  %v1224_v32 = vcombine.high %v163_v27, %v167_v28  ;;  %v171_v35 = vld [vmem:[#allocation8 + $0x118] sm:$0xff]  ;;  %v1221_v37 = vcombine.low %v162_v25, %v166_v26  ;;  %v1223_v38 = vcombine.low %v163_v27, %v167_v28  ;;  %v178_v41 = vld [vmem:[#allocation8 + $0x150] sm:$0xff]  ;;  %v79_v10 = vld [vmem:[#allocation7 + $0x40] sm:$0xff] }
  0x5c   :  { %v175_v36 = vld [vmem:[#allocation8 + $0x138] sm:$0xff]  ;;  %v1230_v39 = vcombine.high %v170_v33, %v174_v34  ;;  %v182_v42 = vld [vmem:[#allocation8 + $0x170] sm:$0xff]  ;;  %v1258_v8 = vcombine.high %v71_v2, %v75_v3  ;;  %v83_v11 = vld [vmem:[#allocation7 + $0x60] sm:$0xff] }
  0x5d   :  { %v1232_v40 = vcombine.high %v171_v35, %v175_v36  ;;  %v1238_v47 = vcombine.high %v178_v41, %v182_v42  ;;  %v186_v49 = vld [vmem:[#allocation8 + $0x190] sm:$0xff]  ;;  %v1266_v17 = vcombine.high %v79_v10, %v83_v11  ;;  %v87_v19 = vld [vmem:[#allocation7 + $0x80] sm:$0xff] }
  0x5e   :  { %529 = vmatpush1.bf16.msra.mxu0 %v1225_v43  ;;  %570 = vmatpush1.bf16.msra.mxu1 %v1227_v44  ;;  %v179_v43 = vld [vmem:[#allocation8 + $0x158] sm:$0xff]  ;;  %v190_v50 = vld [vmem:[#allocation8 + $0x1b0] sm:$0xff]  ;;  %v91_v20 = vld [vmem:[#allocation7 + $0xa0] sm:$0xff] }
  0x5f   :  { %530 = vmatprep.subr.bf16.mxu0 %v1234_v45  ;;  %571 = vmatprep.subr.bf16.mxu1 %v1236_v46  ;;  %v183_v44 = vld [vmem:[#allocation8 + $0x178] sm:$0xff]  ;;  %v1229_v45 = vcombine.low %v170_v33, %v174_v34  ;;  %v1231_v46 = vcombine.low %v171_v35, %v175_v36  ;;  %v1246_v55 = vcombine.high %v186_v49, %v190_v50  ;;  %v194_v57 = vld [vmem:[#allocation8 + $0x1d0] sm:$0xff]  ;;  %v95_v27 = vld [vmem:[#allocation7 + $0xc0] sm:$0xff] }
  0x60   :  { %v1240_v48 = vcombine.high %v179_v43, %v183_v44  ;;  %v198_v58 = vld [vmem:[#allocation8 + $0x1f0] sm:$0xff]  ;;  %v1274_v25 = vcombine.high %v87_v19, %v91_v20  ;;  %v99_v28 = vld [vmem:[#allocation7 + $0xe0] sm:$0xff]  ;;  %v104_v36 = vld [vmem:[#allocation7 + $0x108] sm:$0xff] }
  0x61   :  { %v1254_v63 = vcombine.high %v194_v57, %v198_v58  ;;  %v103_v34 = vld [vmem:[#allocation7 + $0x100] sm:$0xff] }
  0x62   :  { %531 = vmatpush1.bf16.msra.mxu0 %v1233_v51  ;;  %572 = vmatpush1.bf16.msra.mxu1 %v1235_v52  ;;  %v187_v51 = vld [vmem:[#allocation8 + $0x198] sm:$0xff]  ;;  %v107_v35 = vld [vmem:[#allocation7 + $0x120] sm:$0xff] }
  0x63   :  { %532 = vmatprep.subr.bf16.mxu0 %v1242_v53  ;;  %573 = vmatprep.subr.bf16.mxu1 %v1244_v54  ;;  %v191_v52 = vld [vmem:[#allocation8 + $0x1b8] sm:$0xff]  ;;  %v1237_v53 = vcombine.low %v178_v41, %v182_v42  ;;  %v1239_v54 = vcombine.low %v179_v43, %v183_v44  ;;  %v111_v42 = vld [vmem:[#allocation7 + $0x140] sm:$0xff]  ;;  %v112_v44 = vld [vmem:[#allocation7 + $0x148] sm:$0xff] }
  0x64   :  { %v1248_v56 = vcombine.high %v187_v51, %v191_v52  ;;  %v115_v43 = vld [vmem:[#allocation7 + $0x160] sm:$0xff] }
  0x66   :  { %533 = vmatpush1.bf16.msra.mxu0 %v1241_v59  ;;  %574 = vmatpush1.bf16.msra.mxu1 %v1243_v60  ;;  %v195_v59 = vld [vmem:[#allocation8 + $0x1d8] sm:$0xff] }
  0x67   :  { %534 = vmatprep.subr.bf16.mxu0 %v1250_v61  ;;  %575 = vmatprep.subr.bf16.mxu1 %v1252_v62  ;;  %v199_v60 = vld [vmem:[#allocation8 + $0x1f8] sm:$0xff]  ;;  %v1245_v61 = vcombine.low %v186_v49, %v190_v50  ;;  %v1247_v62 = vcombine.low %v187_v51, %v191_v52  ;;  %v119_v50 = vld [vmem:[#allocation7 + $0x180] sm:$0xff]  ;;  %v120_v52 = vld [vmem:[#allocation7 + $0x188] sm:$0xff] }
  0x68   :  { %v1256_v1 = vcombine.high %v195_v59, %v199_v60  ;;  %v123_v51 = vld [vmem:[#allocation7 + $0x1a0] sm:$0xff] }
  0x6a   :  { %535 = vmatpush1.bf16.msra.mxu0 %v1249_v4  ;;  %576 = vmatpush1.bf16.msra.mxu1 %v1251_v5  ;;  %v72_v4 = vld [vmem:[#allocation7 + $0x8] sm:$0xff] }
  0x6b   :  { %602 = vmatprep.subr.bf16.mxu0 %v1198_v6  ;;  %643 = vmatprep.subr.bf16.mxu1 %v1200_v7  ;;  %v76_v5 = vld [vmem:[#allocation7 + $0x28] sm:$0xff]  ;;  %v1253_v6 = vcombine.low %v194_v57, %v198_v58  ;;  %v1255_v7 = vcombine.low %v195_v59, %v199_v60  ;;  %v127_v58 = vld [vmem:[#allocation7 + $0x1c0] sm:$0xff] }
  0x6c   :  { %v1260_v9 = vcombine.high %v72_v4, %v76_v5  ;;  %v131_v59 = vld [vmem:[#allocation7 + $0x1e0] sm:$0xff]  ;;  %v128_v60 = vld [vmem:[#allocation7 + $0x1c8] sm:$0xff] }
  0x6d   :  { %553 = vmatmul.mubr.bf16.vlgmr.msra.gmra.mrb[0].mxu0 %v1546_v13  ;;  %594 = vmatmul.mubr.bf16.vlgmr.msra.gmra.mrb[0].mxu1 %v1546_v13 }
  0x6e   :  { %603 = vmatpush1.bf16.msra.mxu0 %v1197_v12  ;;  %644 = vmatpush1.bf16.msra.mxu1 %v1199_v14  ;;  %v80_v12 = vld [vmem:[#allocation7 + $0x48] sm:$0xff] }
  0x6f   :  { %604 = vmatprep.subr.bf16.mxu0 %v1206_v15  ;;  %645 = vmatprep.subr.bf16.mxu1 %v1208_v16  ;;  %v84_v14 = vld [vmem:[#allocation7 + $0x68] sm:$0xff]  ;;  %v1257_v15 = vcombine.low %v71_v2, %v75_v3  ;;  %v1259_v16 = vcombine.low %v72_v4, %v76_v5  ;;  %v73_v3 = vld [vmem:[#allocation7 + $0x10] sm:$0xff]  ;;  %v74_v5 = vld [vmem:[#allocation7 + $0x18] sm:$0xff] }
  0x70   :  { %634 = vmatprep.mubr.bf16.mxu0 %v1469_v0  ;;  %675 = vmatprep.mubr.bf16.mxu1 %v1469_v0  ;;  %v1268_v18 = vcombine.high %v80_v12, %v84_v14  ;;  %v77_v4 = vld [vmem:[#allocation7 + $0x30] sm:$0xff] }
  0x72   :  { %605 = vmatpush1.bf16.msra.mxu0 %v1205_v21  ;;  %646 = vmatpush1.bf16.msra.mxu1 %v1207_v22  ;;  %v88_v21 = vld [vmem:[#allocation7 + $0x88] sm:$0xff] }
  0x73   :  { %606 = vmatprep.subr.bf16.mxu0 %v1214_v23  ;;  %647 = vmatprep.subr.bf16.mxu1 %v1216_v24  ;;  %v92_v22 = vld [vmem:[#allocation7 + $0xa8] sm:$0xff]  ;;  %v1265_v23 = vcombine.low %v79_v10, %v83_v11  ;;  %v1267_v24 = vcombine.low %v80_v12, %v84_v14  ;;  %v81_v11 = vld [vmem:[#allocation7 + $0x50] sm:$0xff]  ;;  %v82_v14 = vld [vmem:[#allocation7 + $0x58] sm:$0xff] }
  0x74   :  { %v1276_v26 = vcombine.high %v88_v21, %v92_v22  ;;  %v85_v12 = vld [vmem:[#allocation7 + $0x70] sm:$0xff] }
  0x76   :  { %607 = vmatpush1.bf16.msra.mxu0 %v1213_v29  ;;  %648 = vmatpush1.bf16.msra.mxu1 %v1215_v30  ;;  %v96_v29 = vld [vmem:[#allocation7 + $0xc8] sm:$0xff] }
  0x77   :  { %608 = vmatprep.subr.bf16.mxu0 %v1222_v31  ;;  %649 = vmatprep.subr.bf16.mxu1 %v1224_v32  ;;  %v100_v30 = vld [vmem:[#allocation7 + $0xe8] sm:$0xff]  ;;  %v1273_v31 = vcombine.low %v87_v19, %v91_v20  ;;  %v1282_v32 = vcombine.high %v95_v27, %v99_v28  ;;  %v1270_v19 = vcombine.high %v81_v11, %v85_v12 }
  0x78   :  { %v1284_v33 = vcombine.high %v96_v29, %v100_v30 }
  0x7a   :  { %609 = vmatpush1.bf16.msra.mxu0 %v1221_v37  ;;  %650 = vmatpush1.bf16.msra.mxu1 %v1223_v38  ;;  %v108_v37 = vld [vmem:[#allocation7 + $0x128] sm:$0xff]  ;;  %v1281_v38 = vcombine.low %v95_v27, %v99_v28 }
  0x7b   :  { %610 = vmatprep.subr.bf16.mxu0 %v1230_v39  ;;  %651 = vmatprep.subr.bf16.mxu1 %v1232_v40  ;;  %v1283_v39 = vcombine.low %v96_v29, %v100_v30  ;;  %v1290_v40 = vcombine.high %v103_v34, %v107_v35  ;;  %v1292_v41 = vcombine.high %v104_v36, %v108_v37  ;;  %v97_v29 = vld [vmem:[#allocation7 + $0xd0] sm:$0xff] }
  0x7c   :  { %v101_v30 = vld [vmem:[#allocation7 + $0xf0] sm:$0xff] }
  0x7e   :  { %611 = vmatpush1.bf16.msra.mxu0 %v1229_v45  ;;  %652 = vmatpush1.bf16.msra.mxu1 %v1231_v46  ;;  %v116_v45 = vld [vmem:[#allocation7 + $0x168] sm:$0xff]  ;;  %v1289_v46 = vcombine.low %v103_v34, %v107_v35  ;;  %v1286_v34 = vcombine.high %v97_v29, %v101_v30 }
  0x7f   :  { %612 = vmatprep.subr.bf16.mxu0 %v1238_v47  ;;  %653 = vmatprep.subr.bf16.mxu1 %v1240_v48  ;;  %v1291_v47 = vcombine.low %v104_v36, %v108_v37  ;;  %v1298_v48 = vcombine.high %v111_v42, %v115_v43  ;;  %v1300_v49 = vcombine.high %v112_v44, %v116_v45  ;;  %v105_v36 = vld [vmem:[#allocation7 + $0x110] sm:$0xff] }
  0x80   :  { %v109_v37 = vld [vmem:[#allocation7 + $0x130] sm:$0xff] }
  0x82   :  { %613 = vmatpush1.bf16.msra.mxu0 %v1237_v53  ;;  %654 = vmatpush1.bf16.msra.mxu1 %v1239_v54  ;;  %v124_v53 = vld [vmem:[#allocation7 + $0x1a8] sm:$0xff]  ;;  %v1297_v54 = vcombine.low %v111_v42, %v115_v43  ;;  %v1294_v42 = vcombine.high %v105_v36, %v109_v37  ;;  %v113_v43 = vld [vmem:[#allocation7 + $0x150] sm:$0xff] }
  0x83   :  { %614 = vmatprep.subr.bf16.mxu0 %v1246_v55  ;;  %655 = vmatprep.subr.bf16.mxu1 %v1248_v56  ;;  %v1299_v55 = vcombine.low %v112_v44, %v116_v45  ;;  %v1306_v56 = vcombine.high %v119_v50, %v123_v51  ;;  %v1308_v57 = vcombine.high %v120_v52, %v124_v53  ;;  %v117_v44 = vld [vmem:[#allocation7 + $0x170] sm:$0xff]  ;;  %v114_v45 = vld [vmem:[#allocation7 + $0x158] sm:$0xff] }
  0x86   :  { %615 = vmatpush1.bf16.msra.mxu0 %v1245_v61  ;;  %656 = vmatpush1.bf16.msra.mxu1 %v1247_v62  ;;  %v132_v61 = vld [vmem:[#allocation7 + $0x1e8] sm:$0xff]  ;;  %v1305_v62 = vcombine.low %v119_v50, %v123_v51  ;;  %v121_v51 = vld [vmem:[#allocation7 + $0x190] sm:$0xff] }
  0x87   :  { %616 = vmatprep.subr.bf16.mxu0 %v1254_v63  ;;  %657 = vmatprep.subr.bf16.mxu1 %v1256_v1  ;;  %v1307_v63 = vcombine.low %v120_v52, %v124_v53  ;;  %v1314_v1 = vcombine.high %v127_v58, %v131_v59  ;;  %v1316_v2 = vcombine.high %v128_v60, %v132_v61  ;;  %v125_v52 = vld [vmem:[#allocation7 + $0x1b0] sm:$0xff]  ;;  %v122_v53 = vld [vmem:[#allocation7 + $0x198] sm:$0xff] }
  0x8a   :  { %617 = vmatpush1.bf16.msra.mxu0 %v1253_v6  ;;  %658 = vmatpush1.bf16.msra.mxu1 %v1255_v7  ;;  %v78_v6 = vld [vmem:[#allocation7 + $0x38] sm:$0xff]  ;;  %v1313_v7 = vcombine.low %v127_v58, %v131_v59  ;;  %v129_v59 = vld [vmem:[#allocation7 + $0x1d0] sm:$0xff] }
  0x8b   :  { %1004 = vmatprep.subr.bf16.mxu0 %v1258_v8  ;;  %1045 = vmatprep.subr.bf16.mxu1 %v1260_v9  ;;  %v1315_v8 = vcombine.low %v128_v60, %v132_v61  ;;  %v1262_v9 = vcombine.high %v73_v3, %v77_v4  ;;  %v1264_v10 = vcombine.high %v74_v5, %v78_v6  ;;  %v133_v60 = vld [vmem:[#allocation7 + $0x1f0] sm:$0xff]  ;;  %v130_v61 = vld [vmem:[#allocation7 + $0x1d8] sm:$0xff] }
  0x8d   :  { %635 = vmatmul.mubr.bf16.vlgmr.msra.gmra.mrb[4].mxu0 %v1546_v13  ;;  %676 = vmatmul.mubr.bf16.vlgmr.msra.gmra.mrb[4].mxu1 %v1546_v13  ;;  %v1275_v13 = vcombine.low %v88_v21, %v92_v22  ;;  %v89_v21 = vld [vmem:[#allocation7 + $0x90] sm:$0xff] }
  0x8e   :  { %1005 = vmatpush1.bf16.msra.mxu0 %v1257_v15  ;;  %1046 = vmatpush1.bf16.msra.mxu1 %v1259_v16  ;;  %v86_v15 = vld [vmem:[#allocation7 + $0x78] sm:$0xff]  ;;  %v93_v22 = vld [vmem:[#allocation7 + $0xb0] sm:$0xff] }
  0x8f   :  { %1006 = vmatprep.subr.bf16.mxu0 %v1266_v17  ;;  %1047 = vmatprep.subr.bf16.mxu1 %v1268_v18  ;;  %v1556_v16 = vld [vmem:[#allocation2] sm:$0xf]  ;;  %v1261_v17 = vcombine.low %v73_v3, %v77_v4  ;;  %v1263_v18 = vcombine.low %v74_v5, %v78_v6  ;;  %v1272_v20 = vcombine.high %v82_v14, %v86_v15 }
  0x90   :  { %1036 = vmatprep.mubr.bf16.mxu0 %v1469_v0  ;;  %1077 = vmatprep.mubr.bf16.mxu1 %v1469_v0  ;;  %v1278_v27 = vcombine.high %v89_v21, %v93_v22  ;;  %v1317_v4 = vcombine.low %v129_v59, %v133_v60 }
  0x92   :  { %1007 = vmatpush1.bf16.msra.mxu0 %v1265_v23  ;;  %1048 = vmatpush1.bf16.msra.mxu1 %v1267_v24  ;;  %v90_v23 = vld [vmem:[#allocation7 + $0x98] sm:$0xff] }
  0x93   :  { %1008 = vmatprep.subr.bf16.mxu0 %v1274_v25  ;;  %1049 = vmatprep.subr.bf16.mxu1 %v1276_v26  ;;  %v94_v24 = vld [vmem:[#allocation7 + $0xb8] sm:$0xff]  ;;  %v1269_v25 = vcombine.low %v81_v11, %v85_v12  ;;  %v1271_v26 = vcombine.low %v82_v14, %v86_v15 }
  0x94   :  { %v1280_v28 = vcombine.high %v90_v23, %v94_v24 }
  0x96   :  { %1009 = vmatpush1.bf16.msra.mxu0 %v1273_v31  ;;  %1050 = vmatpush1.bf16.msra.mxu1 %v1275_v13  ;;  %v98_v31 = vld [vmem:[#allocation7 + $0xd8] sm:$0xff] }
  0x97   :  { %1010 = vmatprep.subr.bf16.mxu0 %v1282_v32  ;;  %1051 = vmatprep.subr.bf16.mxu1 %v1284_v33  ;;  %v102_v13 = vld [vmem:[#allocation7 + $0xf8] sm:$0xff]  ;;  %v1277_v32 = vcombine.low %v89_v21, %v93_v22  ;;  %v1279_v33 = vcombine.low %v90_v23, %v94_v24 }
  0x98   :  { %v1288_v35 = vcombine.high %v98_v31, %v102_v13 }
  0x9a   :  { %1011 = vmatpush1.bf16.msra.mxu0 %v1281_v38  ;;  %1052 = vmatpush1.bf16.msra.mxu1 %v1283_v39  ;;  %v106_v38 = vld [vmem:[#allocation7 + $0x118] sm:$0xff] }
  0x9b   :  { %1012 = vmatprep.subr.bf16.mxu0 %v1290_v40  ;;  %1053 = vmatprep.subr.bf16.mxu1 %v1292_v41  ;;  %v110_v39 = vld [vmem:[#allocation7 + $0x138] sm:$0xff]  ;;  %v1285_v40 = vcombine.low %v97_v29, %v101_v30  ;;  %v1287_v41 = vcombine.low %v98_v31, %v102_v13 }
  0x9e   :  { %1013 = vmatpush1.bf16.msra.mxu0 %v1289_v46  ;;  %1054 = vmatpush1.bf16.msra.mxu1 %v1291_v47  ;;  %v118_v46 = vld [vmem:[#allocation7 + $0x178] sm:$0xff]  ;;  %v1293_v47 = vcombine.low %v105_v36, %v109_v37 }
  0x9f   :  { %1014 = vmatprep.subr.bf16.mxu0 %v1298_v48  ;;  %1055 = vmatprep.subr.bf16.mxu1 %v1300_v49  ;;  %v1295_v48 = vcombine.low %v106_v38, %v110_v39  ;;  %v1302_v49 = vcombine.high %v113_v43, %v117_v44  ;;  %v1304_v50 = vcombine.high %v114_v45, %v118_v46 }
  0xa2   :  { %1015 = vmatpush1.bf16.msra.mxu0 %v1297_v54  ;;  %1056 = vmatpush1.bf16.msra.mxu1 %v1299_v55  ;;  %v126_v54 = vld [vmem:[#allocation7 + $0x1b8] sm:$0xff]  ;;  %v1301_v55 = vcombine.low %v113_v43, %v117_v44 }
  0xa3   :  { %1016 = vmatprep.subr.bf16.mxu0 %v1306_v56  ;;  %1057 = vmatprep.subr.bf16.mxu1 %v1308_v57  ;;  %v1303_v56 = vcombine.low %v114_v45, %v118_v46  ;;  %v1310_v57 = vcombine.high %v121_v51, %v125_v52  ;;  %v1312_v58 = vcombine.high %v122_v53, %v126_v54 }
  0xa6   :  { %1017 = vmatpush1.bf16.msra.mxu0 %v1305_v62  ;;  %1058 = vmatpush1.bf16.msra.mxu1 %v1307_v63  ;;  %v134_v62 = vld [vmem:[#allocation7 + $0x1f8] sm:$0xff]  ;;  %v1309_v63 = vcombine.low %v121_v51, %v125_v52 }
  0xa7   :  { %1018 = vmatprep.subr.bf16.mxu0 %v1314_v1  ;;  %1059 = vmatprep.subr.bf16.mxu1 %v1316_v2  ;;  %v1311_v1 = vcombine.low %v122_v53, %v126_v54  ;;  %v1318_v2 = vcombine.high %v129_v59, %v133_v60  ;;  %v1320_v3 = vcombine.high %v130_v61, %v134_v62 }
  0xa8   :  { %v1319_v5 = vcombine.low %v130_v61, %v134_v62 }
  0xaa   :  { %1019 = vmatpush1.bf16.msra.mxu0 %v1313_v7  ;;  %1060 = vmatpush1.bf16.msra.mxu1 %v1315_v8 }
  0xab   :  { %1086 = vmatprep.subr.bf16.mxu0 %v1262_v9  ;;  %1127 = vmatprep.subr.bf16.mxu1 %v1264_v10 }
  0xad   :  { %1037 = vmatmul.mubr.bf16.vlgmr.msra.gmra.mrb[0].mxu0 %v1556_v16  ;;  %1078 = vmatmul.mubr.bf16.vlgmr.msra.gmra.mrb[0].mxu1 %v1556_v16 }
  0xae   :  { %1087 = vmatpush1.bf16.msra.mxu0 %v1261_v17  ;;  %1128 = vmatpush1.bf16.msra.mxu1 %v1263_v18 }
  0xaf   :  { %1088 = vmatprep.subr.bf16.mxu0 %v1270_v19  ;;  %1129 = vmatprep.subr.bf16.mxu1 %v1272_v20 }
  0xb0   :  { %1118 = vmatprep.mubr.bf16.mxu0 %v1469_v0  ;;  %1159 = vmatprep.mubr.bf16.mxu1 %v1469_v0  ;;  %v1296_v0 = vcombine.high %v106_v38, %v110_v39 }
  0xb2   :  { %1089 = vmatpush1.bf16.msra.mxu0 %v1269_v25  ;;  %1130 = vmatpush1.bf16.msra.mxu1 %v1271_v26 }
  0xb3   :  { %1090 = vmatprep.subr.bf16.mxu0 %v1278_v27  ;;  %1131 = vmatprep.subr.bf16.mxu1 %v1280_v28 }
  0xb6   :  { %1091 = vmatpush1.bf16.msra.mxu0 %v1277_v32  ;;  %1132 = vmatpush1.bf16.msra.mxu1 %v1279_v33 }
  0xb7   :  { %1092 = vmatprep.subr.bf16.mxu0 %v1286_v34  ;;  %1133 = vmatprep.subr.bf16.mxu1 %v1288_v35 }
  0xba   :  { %1093 = vmatpush1.bf16.msra.mxu0 %v1285_v40  ;;  %1134 = vmatpush1.bf16.msra.mxu1 %v1287_v41 }
  0xbb   :  { %1094 = vmatprep.subr.bf16.mxu0 %v1294_v42  ;;  %1135 = vmatprep.subr.bf16.mxu1 %v1296_v0 }
  0xbe   :  { %1095 = vmatpush1.bf16.msra.mxu0 %v1293_v47  ;;  %1136 = vmatpush1.bf16.msra.mxu1 %v1295_v48 }
  0xbf   :  { %1096 = vmatprep.subr.bf16.mxu0 %v1302_v49  ;;  %1137 = vmatprep.subr.bf16.mxu1 %v1304_v50 }
  0xc2   :  { %1097 = vmatpush1.bf16.msra.mxu0 %v1301_v55  ;;  %1138 = vmatpush1.bf16.msra.mxu1 %v1303_v56 }
  0xc3   :  { %1098 = vmatprep.subr.bf16.mxu0 %v1310_v57  ;;  %1139 = vmatprep.subr.bf16.mxu1 %v1312_v58 }
  0xc6   :  { %1099 = vmatpush1.bf16.msra.mxu0 %v1309_v63  ;;  %1140 = vmatpush1.bf16.msra.mxu1 %v1311_v1 }
  0xc7   :  { %1100 = vmatprep.subr.bf16.mxu0 %v1318_v2  ;;  %1141 = vmatprep.subr.bf16.mxu1 %v1320_v3 }
  0xca   :  { %1101 = vmatpush1.bf16.msra.mxu0 %v1317_v4  ;;  %1142 = vmatpush1.bf16.msra.mxu1 %v1319_v5 }
  0xcd   :  { %1119 = vmatmul.mubr.bf16.vlgmr.msra.gmra.mrb[4].mxu0 %v1556_v16  ;;  %1160 = vmatmul.mubr.bf16.vlgmr.msra.gmra.mrb[4].mxu1 %v1556_v16 }
 0x180   :  { %v1038_v6 = vpop.f32.mrb[0].mxu0  ;;  %v1079_v7 = vpop.f32.mrb[0].mxu1 }
 0x181   :  { %1168 = vst [vmem:[#allocation10] sm:$0xff] %v1038_v6  ;;  %v1040_v8 = vpop.f32.mrb[1].mxu0  ;;  %1170 = vst [vmem:[#allocation10 + $0x10] sm:$0xff] %v1079_v7  ;;  %v1081_v9 = vpop.f32.mrb[1].mxu1 }
 0x182   :  { %1169 = vst [vmem:[#allocation10 + $0x8] sm:$0xff] %v1040_v8  ;;  %v1042_v10 = vpop.f32.mrb[2].mxu0  ;;  %1171 = vst [vmem:[#allocation10 + $0x18] sm:$0xff] %v1081_v9  ;;  %v1083_v11 = vpop.f32.mrb[2].mxu1 }
 0x183   :  { %v1043_v12 = vpop.f32.mrb[3].mxu0  ;;  %v1084_v14 = vpop.f32.mrb[3].mxu1 }
 0x1a0   :  { %v1120_v15 = vpop.f32.mrb[4].mxu0  ;;  %v1161_v17 = vpop.f32.mrb[4].mxu1 }
 0x1a1   :  { %1172 = vst [vmem:[#allocation10 + $0x20] sm:$0xff] %v1120_v15  ;;  %v1122_v18 = vpop.f32.mrb[5].mxu0  ;;  %1174 = vst [vmem:[#allocation10 + $0x30] sm:$0xff] %v1161_v17  ;;  %v1163_v16 = vpop.f32.mrb[5].mxu1 }
 0x1a2   :  { %1173 = vst [vmem:[#allocation10 + $0x28] sm:$0xff] %v1122_v18  ;;  %v1124_v19 = vpop.f32.mrb[6].mxu0  ;;  %1175 = vst [vmem:[#allocation10 + $0x38] sm:$0xff] %v1163_v16  ;;  %v1165_v20 = vpop.f32.mrb[6].mxu1 }
 0x1a3   :  { %v1125_v21 = vpop.f32.mrb[7].mxu0  ;;  %v1166_v22 = vpop.f32.mrb[7].mxu1 }
 0x1a4   :  { %1444 = shalt.err (!%p1441_p8)
}
 0x1a5   :  { %s1445_s13 = scalar_lea.hbm %s1580_s4, 1024 }
 0x1a6   :  { %p1446_p9 = scmp.ne.s32.totalorder %s1580_s4, %s1445_s13  ;;  %p1449_p10 = scmp.lt.u32.totalorder %s1445_s13, %s1580_s4 }
 0x1a8   :  { %p1451_p11 = pnand %p1449_p10, %p1446_p9 }
 0x1aa   :  { %1454 = shalt.err (!%p1451_p11)
}
 0x1ab   :  { %1185 = dma.vmem_to_hbm [thread:$0]  %s1183_s10, 1024, %s1580_s4, [#allocation4]  }
 0x1ac   :  { %1461 = dma.done.wait [#allocation4], 1024  }
 0x1ad   :  { %1462 = vsyncadd [#allocation4], 4294966272 }
 0x1ae   :  { %1189 = vsyncpa [#allocation3], 1 }
 0x1af   :  { %1190 = vsyncpa [#allocation6], 1 }
 0x1b0   :  { %1191 = vsyncpa [#allocation9], 1 }
 0x1b1   :  { %1192 = vsyncpa [#allocation4], 1 }

</bundles_post_ra>
